<compile_context>
chip_gen: v5e
topology: v5e:2x2
jax: 0.10.0
libtpu: 0.0.40
codegen_flags: <defaults>
</compile_context>

<pallas_src>
import functools
import math
import random

import jax
import jax.numpy as jnp
from jax import lax
from jax.experimental import pallas as pl
from jax.experimental.pallas import tpu as pltpu

HIDDEN = 32
SRC_DIM = 16           # source feature dim (kept unpadded)
TGT_DIM = 102          # target_dim hard-coded in the PyTorch forward
TGT_PAD = 128          # lane-dense padded target/output feature dim
SUBLANES = 8           # f32 sublane count -> batch padding multiple


def _round_up(x, m):
    return (x + m - 1) // m * m


# ---------------------- single fused seq2seq kernel -------------------------

def _seq2seq_kernel(tf_ref, src_ref, tgt_ref,
                    ewih_ref, ewhh_ref, eb_ref,
                    dwih_ref, dwhh_ref, db_ref,
                    fcw_ref, fcb_ref,
                    out_ref, *, hidden, n_enc, n_dec):
    B = src_ref.shape[1]
    P = fcw_ref.shape[1]

    # Hoist all weight loads and bias broadcasts out of the (unrolled) loops.
    ewih = ewih_ref[...]                                   # (SRC_DIM, 4H)
    ewhh = ewhh_ref[...]                                   # (H, 4H)
    eb = jnp.broadcast_to(eb_ref[...], (B, 4 * hidden))
    dwih = dwih_ref[...]                                   # (TGT_PAD, 4H)
    dwhh = dwhh_ref[...]                                   # (H, 4H)
    db = jnp.broadcast_to(db_ref[...], (B, 4 * hidden))
    fcw = fcw_ref[...]                                     # (H, TGT_PAD)
    fcb = jnp.broadcast_to(fcb_ref[...], (B, P))

    def lstm_cell(x, h, c, wih, whh, b):
        gates = (jnp.dot(x, wih, preferred_element_type=jnp.float32)
                 + jnp.dot(h, whh, preferred_element_type=jnp.float32)
                 + b)                                      # (B, 4H) one vreg row
        # transcendentals at full 128-lane width (EUP slot); slices feed VPU only
        sig = jax.nn.sigmoid(gates)
        tah = jnp.tanh(gates)
        i = sig[:, 0 * hidden:1 * hidden]
        f = sig[:, 1 * hidden:2 * hidden]
        g = tah[:, 2 * hidden:3 * hidden]
        o = sig[:, 3 * hidden:4 * hidden]
        c_new = f * c + i * g
        h_new = o * jnp.tanh(c_new)
        return h_new, c_new

    zero_h = jnp.zeros((B, hidden), jnp.float32)

    # ---------------- encoder: S steps, h/c carried in vregs ----------------
    def enc_step(s, carry):
        h, c = carry
        return lstm_cell(src_ref[s], h, c, ewih, ewhh, eb)

    h, c = lax.fori_loop(0, n_enc, enc_step, (zero_h, zero_h), unroll=True)

    # ------------- decoder + linear head: T-1 steps, prev fed back ----------
    prev0 = jnp.zeros((B, P), jnp.float32)

    def dec_step(d, carry):
        h, c, prev = carry
        # Teacher forcing: arithmetic 0/1 blend (avoids scalar-bool broadcast).
        # tf_ref[0] == 1 so the first decoder input is target[0], as in PyTorch.
        use_tf = (tf_ref[d] != 0).astype(jnp.float32)
        x = use_tf * tgt_ref[d] + (1.0 - use_tf) * prev     # (B, TGT_PAD)
        h, c = lstm_cell(x, h, c, dwih, dwhh, db)
        out = jnp.dot(h, fcw, preferred_element_type=jnp.float32) + fcb
        out_ref[d] = out                                    # lane-dense (B, 128)
        return h, c, out

    lax.fori_loop(0, n_dec, dec_step, (h, c, prev0), unroll=True)


def run_seq2seq(tf_mask, src, tgt_in, params):
    """src: (S, B, SRC_DIM), tgt_in: (T-1, B, TGT_PAD) -> (T-1, B, TGT_PAD)."""
    S, B, _ = src.shape
    Tm1, _, P = tgt_in.shape
    kernel = functools.partial(_seq2seq_kernel, hidden=HIDDEN,
                               n_enc=S, n_dec=Tm1)

    def full(shape):
        return pl.BlockSpec(shape, lambda i, tf, _s=len(shape): (0,) * _s)

    return pl.pallas_call(
        kernel,
        out_shape=jax.ShapeDtypeStruct((Tm1, B, P), jnp.float32),
        grid_spec=pltpu.PrefetchScalarGridSpec(
            num_scalar_prefetch=1,                 # tf_mask lands in SMEM
            grid=(1,),                             # single invocation; loops in-kernel
            in_specs=[
                full(src.shape),
                full(tgt_in.shape),
                full(params["enc_w_ih"].shape),
                full(params["enc_w_hh"].shape),
                full(params["enc_b"].shape),
                full(params["dec_w_ih"].shape),
                full(params["dec_w_hh"].shape),
                full(params["dec_b"].shape),
                full(params["fc_w"].shape),
                full(params["fc_b"].shape),
            ],
            out_specs=full((Tm1, B, P)),
        ),
        compiler_params=pltpu.CompilerParams(
            dimension_semantics=("arbitrary",)),
    )(tf_mask, src, tgt_in,
      params["enc_w_ih"], params["enc_w_hh"], params["enc_b"],
      params["dec_w_ih"], params["dec_w_hh"], params["dec_b"],
      params["fc_w"], params["fc_b"])


# ----------------------------- parameters -----------------------------------

def _uniform(key, shape, scale):
    return jax.random.uniform(key, shape, jnp.float32, -scale, scale)


def init_params(key):
    ks = jax.random.split(key, 12)
    s = 1.0 / math.sqrt(HIDDEN)  # PyTorch LSTM/Linear default init scale
    # encoder LSTM: SRC_DIM -> HIDDEN (gate order i, f, g, o)
    enc_w_ih = _uniform(ks[0], (SRC_DIM, 4 * HIDDEN), s)
    enc_w_hh = _uniform(ks[1], (HIDDEN, 4 * HIDDEN), s)
    enc_b = _uniform(ks[2], (1, 4 * HIDDEN), s) + _uniform(ks[3], (1, 4 * HIDDEN), s)
    # decoder LSTM: TGT_DIM -> HIDDEN
    dec_w_ih = _uniform(ks[4], (TGT_DIM, 4 * HIDDEN), s)
    dec_w_hh = _uniform(ks[5], (HIDDEN, 4 * HIDDEN), s)
    dec_b = _uniform(ks[6], (1, 4 * HIDDEN), s) + _uniform(ks[7], (1, 4 * HIDDEN), s)
    # output projection HIDDEN -> TGT_DIM
    fc_w = _uniform(ks[8], (HIDDEN, TGT_DIM), s)
    fc_b = _uniform(ks[9], (1, TGT_DIM), s)

    # Only the 102-wide target/output path is padded to 128 lanes.  Padded rows
    # of dec_w_ih and padded lanes of fc_w/fc_b are zero, so the fed-back
    # (non-teacher-forced) decoder path and padded batch rows are exact.
    dec_w_ih = jnp.pad(dec_w_ih, ((0, TGT_PAD - TGT_DIM), (0, 0)))
    fc_w = jnp.pad(fc_w, ((0, 0), (0, TGT_PAD - TGT_DIM)))
    fc_b = jnp.pad(fc_b, ((0, 0), (0, TGT_PAD - TGT_DIM)))
    return {"enc_w_ih": enc_w_ih, "enc_w_hh": enc_w_hh, "enc_b": enc_b,
            "dec_w_ih": dec_w_ih, "dec_w_hh": dec_w_hh, "dec_b": dec_b,
            "fc_w": fc_w, "fc_b": fc_b}


# ----------------------------- forward pass ---------------------------------

@jax.jit
def seq2seq_forward(params, source, target, tf_mask):
    """source: (B, S, SRC_DIM), target: (B, T, TGT_DIM), tf_mask: (T-1,) int32
    -> (B, T, TGT_DIM); outputs[:, 0] == 0 exactly like the PyTorch code."""
    B, S, _ = source.shape
    T = target.shape[1]
    Bp = _round_up(B, SUBLANES)

    # time-major; pad batch to full sublanes; pad only the target feature dim
    src = jnp.transpose(source, (1, 0, 2))                        # (S, B, SRC_DIM)
    tgt = jnp.transpose(target, (1, 0, 2))                        # (T, B, TGT_DIM)
    src = jnp.pad(src, ((0, 0), (0, Bp - B), (0, 0)))
    tgt_in = jnp.pad(tgt[:T - 1],
                     ((0, 0), (0, Bp - B), (0, TGT_PAD - TGT_DIM)))

    dec_out = run_seq2seq(tf_mask, src, tgt_in, params)           # (T-1, Bp, 128)

    dec_out = dec_out[:, :B, :TGT_DIM]                            # strip padding
    outputs = jnp.concatenate(
        [jnp.zeros((1, B, TGT_DIM), jnp.float32), dec_out], axis=0)  # (T, B, TGT_DIM)
    return jnp.transpose(outputs, (1, 0, 2))                      # (B, T, TGT_DIM)


# --------------------------------- main --------------------------------------

if __name__ == "__main__":
    key = jax.random.PRNGKey(0)
    k_params, k_src, k_tgt = jax.random.split(key, 3)

    B, S, T = 2, 8, 8
    params = init_params(k_params)
    source = jax.random.normal(k_src, (B, S, SRC_DIM), jnp.float32)
    target = jax.random.normal(k_tgt, (B, T, TGT_DIM), jnp.float32)

    # Teacher-forcing draws precomputed on the host (deterministic) and passed
    # into the fused kernel via scalar prefetch; tf_mask[0] == 1 because the
    # first decoder input is always target[0] in the PyTorch forward.
    teacher_force_ratio = 1.0
    rng = random.Random(0)
    tf_mask = jnp.asarray(
        [1] + [int(rng.random() < teacher_force_ratio) for _ in range(T - 2)],
        dtype=jnp.int32)                                          # (T-1,)

    out = seq2seq_forward(params, source, target, tf_mask)
    out = jax.block_until_ready(out)
    assert out.shape == (B, T, TGT_DIM), out.shape
    print("KERNEL_OK")
</pallas_src>

<mosaic_0001>
module attributes {stable_mosaic.version = 11 : i64} {
  func.func @_seq2seq_kernel(%arg0: i32, %arg1: memref<7xi32, #tpu.memory_space<smem>>, %arg2: memref<8x8x16xf32, #tpu.memory_space<vmem>>, %arg3: memref<7x8x128xf32, #tpu.memory_space<vmem>>, %arg4: memref<16x128xf32, #tpu.memory_space<vmem>>, %arg5: memref<32x128xf32, #tpu.memory_space<vmem>>, %arg6: memref<1x128xf32, #tpu.memory_space<vmem>>, %arg7: memref<128x128xf32, #tpu.memory_space<vmem>>, %arg8: memref<32x128xf32, #tpu.memory_space<vmem>>, %arg9: memref<1x128xf32, #tpu.memory_space<vmem>>, %arg10: memref<32x128xf32, #tpu.memory_space<vmem>>, %arg11: memref<1x128xf32, #tpu.memory_space<vmem>>, %arg12: memref<7x8x128xf32, #tpu.memory_space<vmem>>) attributes {dimension_semantics = [#tpu.dimension_semantics<arbitrary>], iteration_bounds = array<i64: 1>, scalar_prefetch = 1 : i64, scratch_operands = 0 : i64, tpu.core_type = #tpu.core_type<tc>, window_params = [{pipeline_mode = #tpu.pipeline_mode<synchronous>, transform_indices = @transform_0, window_bounds = array<i64: 8, 8, 16>}, {pipeline_mode = #tpu.pipeline_mode<synchronous>, transform_indices = @transform_1, window_bounds = array<i64: 7, 8, 128>}, {pipeline_mode = #tpu.pipeline_mode<synchronous>, transform_indices = @transform_2, window_bounds = array<i64: 16, 128>}, {pipeline_mode = #tpu.pipeline_mode<synchronous>, transform_indices = @transform_3, window_bounds = array<i64: 32, 128>}, {pipeline_mode = #tpu.pipeline_mode<synchronous>, transform_indices = @transform_4, window_bounds = array<i64: 1, 128>}, {pipeline_mode = #tpu.pipeline_mode<synchronous>, transform_indices = @transform_5, window_bounds = array<i64: 128, 128>}, {pipeline_mode = #tpu.pipeline_mode<synchronous>, transform_indices = @transform_6, window_bounds = array<i64: 32, 128>}, {pipeline_mode = #tpu.pipeline_mode<synchronous>, transform_indices = @transform_7, window_bounds = array<i64: 1, 128>}, {pipeline_mode = #tpu.pipeline_mode<synchronous>, transform_indices = @transform_8, window_bounds = array<i64: 32, 128>}, {pipeline_mode = #tpu.pipeline_mode<synchronous>, transform_indices = @transform_9, window_bounds = array<i64: 1, 128>}, {pipeline_mode = #tpu.pipeline_mode<synchronous>, transform_indices = @transform_10, window_bounds = array<i64: 7, 8, 128>}]} {
    %c0 = arith.constant 0 : index
    %c0_0 = arith.constant 0 : index
    %0 = vector.load %arg4[%c0, %c0_0] : memref<16x128xf32, #tpu.memory_space<vmem>>, vector<16x128xf32>
    %c0_1 = arith.constant 0 : index
    %c0_2 = arith.constant 0 : index
    %1 = vector.load %arg5[%c0_1, %c0_2] : memref<32x128xf32, #tpu.memory_space<vmem>>, vector<32x128xf32>
    %c0_3 = arith.constant 0 : index
    %c0_4 = arith.constant 0 : index
    %2 = vector.load %arg6[%c0_3, %c0_4] : memref<1x128xf32, #tpu.memory_space<vmem>>, vector<1x128xf32>
    %3 = vector.shape_cast %2 : vector<1x128xf32> to vector<1x128xf32>
    %4 = vector.broadcast %3 : vector<1x128xf32> to vector<8x128xf32>
    %c0_5 = arith.constant 0 : index
    %c0_6 = arith.constant 0 : index
    %5 = vector.load %arg7[%c0_5, %c0_6] : memref<128x128xf32, #tpu.memory_space<vmem>>, vector<128x128xf32>
    %c0_7 = arith.constant 0 : index
    %c0_8 = arith.constant 0 : index
    %6 = vector.load %arg8[%c0_7, %c0_8] : memref<32x128xf32, #tpu.memory_space<vmem>>, vector<32x128xf32>
    %c0_9 = arith.constant 0 : index
    %c0_10 = arith.constant 0 : index
    %7 = vector.load %arg9[%c0_9, %c0_10] : memref<1x128xf32, #tpu.memory_space<vmem>>, vector<1x128xf32>
    %8 = vector.shape_cast %7 : vector<1x128xf32> to vector<1x128xf32>
    %9 = vector.broadcast %8 : vector<1x128xf32> to vector<8x128xf32>
    %c0_11 = arith.constant 0 : index
    %c0_12 = arith.constant 0 : index
    %10 = vector.load %arg10[%c0_11, %c0_12] : memref<32x128xf32, #tpu.memory_space<vmem>>, vector<32x128xf32>
    %c0_13 = arith.constant 0 : index
    %c0_14 = arith.constant 0 : index
    %11 = vector.load %arg11[%c0_13, %c0_14] : memref<1x128xf32, #tpu.memory_space<vmem>>, vector<1x128xf32>
    %12 = vector.shape_cast %11 : vector<1x128xf32> to vector<1x128xf32>
    %13 = vector.broadcast %12 : vector<1x128xf32> to vector<8x128xf32>
    %cst = arith.constant 0.000000e+00 : f32
    %14 = vector.broadcast %cst : f32 to vector<8x32xf32>
    %c0_i32 = arith.constant 0 : i32
    %15 = arith.index_cast %c0_i32 : i32 to index
    %c0_15 = arith.constant 0 : index
    %c0_16 = arith.constant 0 : index
    %16 = vector.load %arg2[%15, %c0_15, %c0_16] : memref<8x8x16xf32, #tpu.memory_space<vmem>>, vector<1x8x16xf32>
    %17 = vector.shape_cast %16 : vector<1x8x16xf32> to vector<8x16xf32>
    %cst_17 = arith.constant dense<0.000000e+00> : vector<8x128xf32>
    %18 = tpu.matmul %17, %0, %cst_17 {dimension_numbers = #tpu.dot_dimension_numbers<[1], [0], [0], [1], [0, 0, 1, 1], [], []>} : vector<8x16xf32>, vector<16x128xf32>, vector<8x128xf32> -> vector<8x128xf32>
    %cst_18 = arith.constant dense<0.000000e+00> : vector<8x128xf32>
    %19 = tpu.matmul %14, %1, %cst_18 {dimension_numbers = #tpu.dot_dimension_numbers<[1], [0], [0], [1], [0, 0, 1, 1], [], []>} : vector<8x32xf32>, vector<32x128xf32>, vector<8x128xf32> -> vector<8x128xf32>
    %20 = arith.addf %18, %19 : vector<8x128xf32>
    %21 = arith.addf %20, %4 : vector<8x128xf32>
    %22 = arith.negf %21 : vector<8x128xf32>
    %23 = math.exp %22 : vector<8x128xf32>
    %cst_19 = arith.constant 1.000000e+00 : f32
    %24 = vector.broadcast %cst_19 : f32 to vector<8x128xf32>
    %25 = arith.addf %24, %23 : vector<8x128xf32>
    %26 = arith.divf %24, %25 : vector<8x128xf32>
    %27 = math.tanh %21 : vector<8x128xf32>
    %28 = vector.extract_strided_slice %26 {offsets = [0, 0], sizes = [8, 32], strides = [1, 1]} : vector<8x128xf32> to vector<8x32xf32>
    %29 = vector.extract_strided_slice %26 {offsets = [0, 32], sizes = [8, 32], strides = [1, 1]} : vector<8x128xf32> to vector<8x32xf32>
    %30 = vector.extract_strided_slice %27 {offsets = [0, 64], sizes = [8, 32], strides = [1, 1]} : vector<8x128xf32> to vector<8x32xf32>
    %31 = vector.extract_strided_slice %26 {offsets = [0, 96], sizes = [8, 32], strides = [1, 1]} : vector<8x128xf32> to vector<8x32xf32>
    %32 = arith.mulf %29, %14 : vector<8x32xf32>
    %33 = arith.mulf %28, %30 : vector<8x32xf32>
    %34 = arith.addf %32, %33 : vector<8x32xf32>
    %35 = math.tanh %34 : vector<8x32xf32>
    %36 = arith.mulf %31, %35 : vector<8x32xf32>
    %c1_i32 = arith.constant 1 : i32
    %37 = arith.index_cast %c1_i32 : i32 to index
    %c0_20 = arith.constant 0 : index
    %c0_21 = arith.constant 0 : index
    %38 = vector.load %arg2[%37, %c0_20, %c0_21] : memref<8x8x16xf32, #tpu.memory_space<vmem>>, vector<1x8x16xf32>
    %39 = vector.shape_cast %38 : vector<1x8x16xf32> to vector<8x16xf32>
    %cst_22 = arith.constant dense<0.000000e+00> : vector<8x128xf32>
    %40 = tpu.matmul %39, %0, %cst_22 {dimension_numbers = #tpu.dot_dimension_numbers<[1], [0], [0], [1], [0, 0, 1, 1], [], []>} : vector<8x16xf32>, vector<16x128xf32>, vector<8x128xf32> -> vector<8x128xf32>
    %cst_23 = arith.constant dense<0.000000e+00> : vector<8x128xf32>
    %41 = tpu.matmul %36, %1, %cst_23 {dimension_numbers = #tpu.dot_dimension_numbers<[1], [0], [0], [1], [0, 0, 1, 1], [], []>} : vector<8x32xf32>, vector<32x128xf32>, vector<8x128xf32> -> vector<8x128xf32>
    %42 = arith.addf %40, %41 : vector<8x128xf32>
    %43 = arith.addf %42, %4 : vector<8x128xf32>
    %44 = arith.negf %43 : vector<8x128xf32>
    %45 = math.exp %44 : vector<8x128xf32>
    %cst_24 = arith.constant 1.000000e+00 : f32
    %46 = vector.broadcast %cst_24 : f32 to vector<8x128xf32>
    %47 = arith.addf %46, %45 : vector<8x128xf32>
    %48 = arith.divf %46, %47 : vector<8x128xf32>
    %49 = math.tanh %43 : vector<8x128xf32>
    %50 = vector.extract_strided_slice %48 {offsets = [0, 0], sizes = [8, 32], strides = [1, 1]} : vector<8x128xf32> to vector<8x32xf32>
    %51 = vector.extract_strided_slice %48 {offsets = [0, 32], sizes = [8, 32], strides = [1, 1]} : vector<8x128xf32> to vector<8x32xf32>
    %52 = vector.extract_strided_slice %49 {offsets = [0, 64], sizes = [8, 32], strides = [1, 1]} : vector<8x128xf32> to vector<8x32xf32>
    %53 = vector.extract_strided_slice %48 {offsets = [0, 96], sizes = [8, 32], strides = [1, 1]} : vector<8x128xf32> to vector<8x32xf32>
    %54 = arith.mulf %51, %34 : vector<8x32xf32>
    %55 = arith.mulf %50, %52 : vector<8x32xf32>
    %56 = arith.addf %54, %55 : vector<8x32xf32>
    %57 = math.tanh %56 : vector<8x32xf32>
    %58 = arith.mulf %53, %57 : vector<8x32xf32>
    %c2_i32 = arith.constant 2 : i32
    %59 = arith.index_cast %c2_i32 : i32 to index
    %c0_25 = arith.constant 0 : index
    %c0_26 = arith.constant 0 : index
    %60 = vector.load %arg2[%59, %c0_25, %c0_26] : memref<8x8x16xf32, #tpu.memory_space<vmem>>, vector<1x8x16xf32>
    %61 = vector.shape_cast %60 : vector<1x8x16xf32> to vector<8x16xf32>
    %cst_27 = arith.constant dense<0.000000e+00> : vector<8x128xf32>
    %62 = tpu.matmul %61, %0, %cst_27 {dimension_numbers = #tpu.dot_dimension_numbers<[1], [0], [0], [1], [0, 0, 1, 1], [], []>} : vector<8x16xf32>, vector<16x128xf32>, vector<8x128xf32> -> vector<8x128xf32>
    %cst_28 = arith.constant dense<0.000000e+00> : vector<8x128xf32>
    %63 = tpu.matmul %58, %1, %cst_28 {dimension_numbers = #tpu.dot_dimension_numbers<[1], [0], [0], [1], [0, 0, 1, 1], [], []>} : vector<8x32xf32>, vector<32x128xf32>, vector<8x128xf32> -> vector<8x128xf32>
    %64 = arith.addf %62, %63 : vector<8x128xf32>
    %65 = arith.addf %64, %4 : vector<8x128xf32>
    %66 = arith.negf %65 : vector<8x128xf32>
    %67 = math.exp %66 : vector<8x128xf32>
    %cst_29 = arith.constant 1.000000e+00 : f32
    %68 = vector.broadcast %cst_29 : f32 to vector<8x128xf32>
    %69 = arith.addf %68, %67 : vector<8x128xf32>
    %70 = arith.divf %68, %69 : vector<8x128xf32>
    %71 = math.tanh %65 : vector<8x128xf32>
    %72 = vector.extract_strided_slice %70 {offsets = [0, 0], sizes = [8, 32], strides = [1, 1]} : vector<8x128xf32> to vector<8x32xf32>
    %73 = vector.extract_strided_slice %70 {offsets = [0, 32], sizes = [8, 32], strides = [1, 1]} : vector<8x128xf32> to vector<8x32xf32>
    %74 = vector.extract_strided_slice %71 {offsets = [0, 64], sizes = [8, 32], strides = [1, 1]} : vector<8x128xf32> to vector<8x32xf32>
    %75 = vector.extract_strided_slice %70 {offsets = [0, 96], sizes = [8, 32], strides = [1, 1]} : vector<8x128xf32> to vector<8x32xf32>
    %76 = arith.mulf %73, %56 : vector<8x32xf32>
    %77 = arith.mulf %72, %74 : vector<8x32xf32>
    %78 = arith.addf %76, %77 : vector<8x32xf32>
    %79 = math.tanh %78 : vector<8x32xf32>
    %80 = arith.mulf %75, %79 : vector<8x32xf32>
    %c3_i32 = arith.constant 3 : i32
    %81 = arith.index_cast %c3_i32 : i32 to index
    %c0_30 = arith.constant 0 : index
    %c0_31 = arith.constant 0 : index
    %82 = vector.load %arg2[%81, %c0_30, %c0_31] : memref<8x8x16xf32, #tpu.memory_space<vmem>>, vector<1x8x16xf32>
    %83 = vector.shape_cast %82 : vector<1x8x16xf32> to vector<8x16xf32>
    %cst_32 = arith.constant dense<0.000000e+00> : vector<8x128xf32>
    %84 = tpu.matmul %83, %0, %cst_32 {dimension_numbers = #tpu.dot_dimension_numbers<[1], [0], [0], [1], [0, 0, 1, 1], [], []>} : vector<8x16xf32>, vector<16x128xf32>, vector<8x128xf32> -> vector<8x128xf32>
    %cst_33 = arith.constant dense<0.000000e+00> : vector<8x128xf32>
    %85 = tpu.matmul %80, %1, %cst_33 {dimension_numbers = #tpu.dot_dimension_numbers<[1], [0], [0], [1], [0, 0, 1, 1], [], []>} : vector<8x32xf32>, vector<32x128xf32>, vector<8x128xf32> -> vector<8x128xf32>
    %86 = arith.addf %84, %85 : vector<8x128xf32>
    %87 = arith.addf %86, %4 : vector<8x128xf32>
    %88 = arith.negf %87 : vector<8x128xf32>
    %89 = math.exp %88 : vector<8x128xf32>
    %cst_34 = arith.constant 1.000000e+00 : f32
    %90 = vector.broadcast %cst_34 : f32 to vector<8x128xf32>
    %91 = arith.addf %90, %89 : vector<8x128xf32>
    %92 = arith.divf %90, %91 : vector<8x128xf32>
    %93 = math.tanh %87 : vector<8x128xf32>
    %94 = vector.extract_strided_slice %92 {offsets = [0, 0], sizes = [8, 32], strides = [1, 1]} : vector<8x128xf32> to vector<8x32xf32>
    %95 = vector.extract_strided_slice %92 {offsets = [0, 32], sizes = [8, 32], strides = [1, 1]} : vector<8x128xf32> to vector<8x32xf32>
    %96 = vector.extract_strided_slice %93 {offsets = [0, 64], sizes = [8, 32], strides = [1, 1]} : vector<8x128xf32> to vector<8x32xf32>
    %97 = vector.extract_strided_slice %92 {offsets = [0, 96], sizes = [8, 32], strides = [1, 1]} : vector<8x128xf32> to vector<8x32xf32>
    %98 = arith.mulf %95, %78 : vector<8x32xf32>
    %99 = arith.mulf %94, %96 : vector<8x32xf32>
    %100 = arith.addf %98, %99 : vector<8x32xf32>
    %101 = math.tanh %100 : vector<8x32xf32>
    %102 = arith.mulf %97, %101 : vector<8x32xf32>
    %c4_i32 = arith.constant 4 : i32
    %103 = arith.index_cast %c4_i32 : i32 to index
    %c0_35 = arith.constant 0 : index
    %c0_36 = arith.constant 0 : index
    %104 = vector.load %arg2[%103, %c0_35, %c0_36] : memref<8x8x16xf32, #tpu.memory_space<vmem>>, vector<1x8x16xf32>
    %105 = vector.shape_cast %104 : vector<1x8x16xf32> to vector<8x16xf32>
    %cst_37 = arith.constant dense<0.000000e+00> : vector<8x128xf32>
    %106 = tpu.matmul %105, %0, %cst_37 {dimension_numbers = #tpu.dot_dimension_numbers<[1], [0], [0], [1], [0, 0, 1, 1], [], []>} : vector<8x16xf32>, vector<16x128xf32>, vector<8x128xf32> -> vector<8x128xf32>
    %cst_38 = arith.constant dense<0.000000e+00> : vector<8x128xf32>
    %107 = tpu.matmul %102, %1, %cst_38 {dimension_numbers = #tpu.dot_dimension_numbers<[1], [0], [0], [1], [0, 0, 1, 1], [], []>} : vector<8x32xf32>, vector<32x128xf32>, vector<8x128xf32> -> vector<8x128xf32>
    %108 = arith.addf %106, %107 : vector<8x128xf32>
    %109 = arith.addf %108, %4 : vector<8x128xf32>
    %110 = arith.negf %109 : vector<8x128xf32>
    %111 = math.exp %110 : vector<8x128xf32>
    %cst_39 = arith.constant 1.000000e+00 : f32
    %112 = vector.broadcast %cst_39 : f32 to vector<8x128xf32>
    %113 = arith.addf %112, %111 : vector<8x128xf32>
    %114 = arith.divf %112, %113 : vector<8x128xf32>
    %115 = math.tanh %109 : vector<8x128xf32>
    %116 = vector.extract_strided_slice %114 {offsets = [0, 0], sizes = [8, 32], strides = [1, 1]} : vector<8x128xf32> to vector<8x32xf32>
    %117 = vector.extract_strided_slice %114 {offsets = [0, 32], sizes = [8, 32], strides = [1, 1]} : vector<8x128xf32> to vector<8x32xf32>
    %118 = vector.extract_strided_slice %115 {offsets = [0, 64], sizes = [8, 32], strides = [1, 1]} : vector<8x128xf32> to vector<8x32xf32>
    %119 = vector.extract_strided_slice %114 {offsets = [0, 96], sizes = [8, 32], strides = [1, 1]} : vector<8x128xf32> to vector<8x32xf32>
    %120 = arith.mulf %117, %100 : vector<8x32xf32>
    %121 = arith.mulf %116, %118 : vector<8x32xf32>
    %122 = arith.addf %120, %121 : vector<8x32xf32>
    %123 = math.tanh %122 : vector<8x32xf32>
    %124 = arith.mulf %119, %123 : vector<8x32xf32>
    %c5_i32 = arith.constant 5 : i32
    %125 = arith.index_cast %c5_i32 : i32 to index
    %c0_40 = arith.constant 0 : index
    %c0_41 = arith.constant 0 : index
    %126 = vector.load %arg2[%125, %c0_40, %c0_41] : memref<8x8x16xf32, #tpu.memory_space<vmem>>, vector<1x8x16xf32>
    %127 = vector.shape_cast %126 : vector<1x8x16xf32> to vector<8x16xf32>
    %cst_42 = arith.constant dense<0.000000e+00> : vector<8x128xf32>
    %128 = tpu.matmul %127, %0, %cst_42 {dimension_numbers = #tpu.dot_dimension_numbers<[1], [0], [0], [1], [0, 0, 1, 1], [], []>} : vector<8x16xf32>, vector<16x128xf32>, vector<8x128xf32> -> vector<8x128xf32>
    %cst_43 = arith.constant dense<0.000000e+00> : vector<8x128xf32>
    %129 = tpu.matmul %124, %1, %cst_43 {dimension_numbers = #tpu.dot_dimension_numbers<[1], [0], [0], [1], [0, 0, 1, 1], [], []>} : vector<8x32xf32>, vector<32x128xf32>, vector<8x128xf32> -> vector<8x128xf32>
    %130 = arith.addf %128, %129 : vector<8x128xf32>
    %131 = arith.addf %130, %4 : vector<8x128xf32>
    %132 = arith.negf %131 : vector<8x128xf32>
    %133 = math.exp %132 : vector<8x128xf32>
    %cst_44 = arith.constant 1.000000e+00 : f32
    %134 = vector.broadcast %cst_44 : f32 to vector<8x128xf32>
    %135 = arith.addf %134, %133 : vector<8x128xf32>
    %136 = arith.divf %134, %135 : vector<8x128xf32>
    %137 = math.tanh %131 : vector<8x128xf32>
    %138 = vector.extract_strided_slice %136 {offsets = [0, 0], sizes = [8, 32], strides = [1, 1]} : vector<8x128xf32> to vector<8x32xf32>
    %139 = vector.extract_strided_slice %136 {offsets = [0, 32], sizes = [8, 32], strides = [1, 1]} : vector<8x128xf32> to vector<8x32xf32>
    %140 = vector.extract_strided_slice %137 {offsets = [0, 64], sizes = [8, 32], strides = [1, 1]} : vector<8x128xf32> to vector<8x32xf32>
    %141 = vector.extract_strided_slice %136 {offsets = [0, 96], sizes = [8, 32], strides = [1, 1]} : vector<8x128xf32> to vector<8x32xf32>
    %142 = arith.mulf %139, %122 : vector<8x32xf32>
    %143 = arith.mulf %138, %140 : vector<8x32xf32>
    %144 = arith.addf %142, %143 : vector<8x32xf32>
    %145 = math.tanh %144 : vector<8x32xf32>
    %146 = arith.mulf %141, %145 : vector<8x32xf32>
    %c6_i32 = arith.constant 6 : i32
    %147 = arith.index_cast %c6_i32 : i32 to index
    %c0_45 = arith.constant 0 : index
    %c0_46 = arith.constant 0 : index
    %148 = vector.load %arg2[%147, %c0_45, %c0_46] : memref<8x8x16xf32, #tpu.memory_space<vmem>>, vector<1x8x16xf32>
    %149 = vector.shape_cast %148 : vector<1x8x16xf32> to vector<8x16xf32>
    %cst_47 = arith.constant dense<0.000000e+00> : vector<8x128xf32>
    %150 = tpu.matmul %149, %0, %cst_47 {dimension_numbers = #tpu.dot_dimension_numbers<[1], [0], [0], [1], [0, 0, 1, 1], [], []>} : vector<8x16xf32>, vector<16x128xf32>, vector<8x128xf32> -> vector<8x128xf32>
    %cst_48 = arith.constant dense<0.000000e+00> : vector<8x128xf32>
    %151 = tpu.matmul %146, %1, %cst_48 {dimension_numbers = #tpu.dot_dimension_numbers<[1], [0], [0], [1], [0, 0, 1, 1], [], []>} : vector<8x32xf32>, vector<32x128xf32>, vector<8x128xf32> -> vector<8x128xf32>
    %152 = arith.addf %150, %151 : vector<8x128xf32>
    %153 = arith.addf %152, %4 : vector<8x128xf32>
    %154 = arith.negf %153 : vector<8x128xf32>
    %155 = math.exp %154 : vector<8x128xf32>
    %cst_49 = arith.constant 1.000000e+00 : f32
    %156 = vector.broadcast %cst_49 : f32 to vector<8x128xf32>
    %157 = arith.addf %156, %155 : vector<8x128xf32>
    %158 = arith.divf %156, %157 : vector<8x128xf32>
    %159 = math.tanh %153 : vector<8x128xf32>
    %160 = vector.extract_strided_slice %158 {offsets = [0, 0], sizes = [8, 32], strides = [1, 1]} : vector<8x128xf32> to vector<8x32xf32>
    %161 = vector.extract_strided_slice %158 {offsets = [0, 32], sizes = [8, 32], strides = [1, 1]} : vector<8x128xf32> to vector<8x32xf32>
    %162 = vector.extract_strided_slice %159 {offsets = [0, 64], sizes = [8, 32], strides = [1, 1]} : vector<8x128xf32> to vector<8x32xf32>
    %163 = vector.extract_strided_slice %158 {offsets = [0, 96], sizes = [8, 32], strides = [1, 1]} : vector<8x128xf32> to vector<8x32xf32>
    %164 = arith.mulf %161, %144 : vector<8x32xf32>
    %165 = arith.mulf %160, %162 : vector<8x32xf32>
    %166 = arith.addf %164, %165 : vector<8x32xf32>
    %167 = math.tanh %166 : vector<8x32xf32>
    %168 = arith.mulf %163, %167 : vector<8x32xf32>
    %c7_i32 = arith.constant 7 : i32
    %169 = arith.index_cast %c7_i32 : i32 to index
    %c0_50 = arith.constant 0 : index
    %c0_51 = arith.constant 0 : index
    %170 = vector.load %arg2[%169, %c0_50, %c0_51] : memref<8x8x16xf32, #tpu.memory_space<vmem>>, vector<1x8x16xf32>
    %171 = vector.shape_cast %170 : vector<1x8x16xf32> to vector<8x16xf32>
    %cst_52 = arith.constant dense<0.000000e+00> : vector<8x128xf32>
    %172 = tpu.matmul %171, %0, %cst_52 {dimension_numbers = #tpu.dot_dimension_numbers<[1], [0], [0], [1], [0, 0, 1, 1], [], []>} : vector<8x16xf32>, vector<16x128xf32>, vector<8x128xf32> -> vector<8x128xf32>
    %cst_53 = arith.constant dense<0.000000e+00> : vector<8x128xf32>
    %173 = tpu.matmul %168, %1, %cst_53 {dimension_numbers = #tpu.dot_dimension_numbers<[1], [0], [0], [1], [0, 0, 1, 1], [], []>} : vector<8x32xf32>, vector<32x128xf32>, vector<8x128xf32> -> vector<8x128xf32>
    %174 = arith.addf %172, %173 : vector<8x128xf32>
    %175 = arith.addf %174, %4 : vector<8x128xf32>
    %176 = arith.negf %175 : vector<8x128xf32>
    %177 = math.exp %176 : vector<8x128xf32>
    %cst_54 = arith.constant 1.000000e+00 : f32
    %178 = vector.broadcast %cst_54 : f32 to vector<8x128xf32>
    %179 = arith.addf %178, %177 : vector<8x128xf32>
    %180 = arith.divf %178, %179 : vector<8x128xf32>
    %181 = math.tanh %175 : vector<8x128xf32>
    %182 = vector.extract_strided_slice %180 {offsets = [0, 0], sizes = [8, 32], strides = [1, 1]} : vector<8x128xf32> to vector<8x32xf32>
    %183 = vector.extract_strided_slice %180 {offsets = [0, 32], sizes = [8, 32], strides = [1, 1]} : vector<8x128xf32> to vector<8x32xf32>
    %184 = vector.extract_strided_slice %181 {offsets = [0, 64], sizes = [8, 32], strides = [1, 1]} : vector<8x128xf32> to vector<8x32xf32>
    %185 = vector.extract_strided_slice %180 {offsets = [0, 96], sizes = [8, 32], strides = [1, 1]} : vector<8x128xf32> to vector<8x32xf32>
    %186 = arith.mulf %183, %166 : vector<8x32xf32>
    %187 = arith.mulf %182, %184 : vector<8x32xf32>
    %188 = arith.addf %186, %187 : vector<8x32xf32>
    %189 = math.tanh %188 : vector<8x32xf32>
    %190 = arith.mulf %185, %189 : vector<8x32xf32>
    %c8_i32 = arith.constant 8 : i32
    %cst_55 = arith.constant 0.000000e+00 : f32
    %191 = vector.broadcast %cst_55 : f32 to vector<8x128xf32>
    %c0_i32_56 = arith.constant 0 : i32
    %192 = arith.index_cast %c0_i32_56 : i32 to index
    %193 = memref.load %arg1[%192] : memref<7xi32, #tpu.memory_space<smem>>
    %c0_i32_57 = arith.constant 0 : i32
    %194 = arith.cmpi ne, %193, %c0_i32_57 : i32
    %195 = arith.extui %194 : i1 to i32
    %196 = arith.sitofp %195 : i32 to f32
    %197 = arith.index_cast %c0_i32_56 : i32 to index
    %c0_58 = arith.constant 0 : index
    %c0_59 = arith.constant 0 : index
    %198 = vector.load %arg3[%197, %c0_58, %c0_59] : memref<7x8x128xf32, #tpu.memory_space<vmem>>, vector<1x8x128xf32>
    %199 = vector.shape_cast %198 : vector<1x8x128xf32> to vector<8x128xf32>
    %200 = vector.broadcast %196 : f32 to vector<8x128xf32>
    %201 = arith.mulf %200, %199 : vector<8x128xf32>
    %cst_60 = arith.constant 1.000000e+00 : f32
    %202 = arith.subf %cst_60, %196 : f32
    %203 = vector.broadcast %202 : f32 to vector<8x128xf32>
    %204 = arith.mulf %203, %191 : vector<8x128xf32>
    %205 = arith.addf %201, %204 : vector<8x128xf32>
    %cst_61 = arith.constant dense<0.000000e+00> : vector<8x128xf32>
    %206 = tpu.matmul %205, %5, %cst_61 {dimension_numbers = #tpu.dot_dimension_numbers<[1], [0], [0], [1], [0, 0, 1, 1], [], []>} : vector<8x128xf32>, vector<128x128xf32>, vector<8x128xf32> -> vector<8x128xf32>
    %cst_62 = arith.constant dense<0.000000e+00> : vector<8x128xf32>
    %207 = tpu.matmul %190, %6, %cst_62 {dimension_numbers = #tpu.dot_dimension_numbers<[1], [0], [0], [1], [0, 0, 1, 1], [], []>} : vector<8x32xf32>, vector<32x128xf32>, vector<8x128xf32> -> vector<8x128xf32>
    %208 = arith.addf %206, %207 : vector<8x128xf32>
    %209 = arith.addf %208, %9 : vector<8x128xf32>
    %210 = arith.negf %209 : vector<8x128xf32>
    %211 = math.exp %210 : vector<8x128xf32>
    %cst_63 = arith.constant 1.000000e+00 : f32
    %212 = vector.broadcast %cst_63 : f32 to vector<8x128xf32>
    %213 = arith.addf %212, %211 : vector<8x128xf32>
    %214 = arith.divf %212, %213 : vector<8x128xf32>
    %215 = math.tanh %209 : vector<8x128xf32>
    %216 = vector.extract_strided_slice %214 {offsets = [0, 0], sizes = [8, 32], strides = [1, 1]} : vector<8x128xf32> to vector<8x32xf32>
    %217 = vector.extract_strided_slice %214 {offsets = [0, 32], sizes = [8, 32], strides = [1, 1]} : vector<8x128xf32> to vector<8x32xf32>
    %218 = vector.extract_strided_slice %215 {offsets = [0, 64], sizes = [8, 32], strides = [1, 1]} : vector<8x128xf32> to vector<8x32xf32>
    %219 = vector.extract_strided_slice %214 {offsets = [0, 96], sizes = [8, 32], strides = [1, 1]} : vector<8x128xf32> to vector<8x32xf32>
    %220 = arith.mulf %217, %188 : vector<8x32xf32>
    %221 = arith.mulf %216, %218 : vector<8x32xf32>
    %222 = arith.addf %220, %221 : vector<8x32xf32>
    %223 = math.tanh %222 : vector<8x32xf32>
    %224 = arith.mulf %219, %223 : vector<8x32xf32>
    %cst_64 = arith.constant dense<0.000000e+00> : vector<8x128xf32>
    %225 = tpu.matmul %224, %10, %cst_64 {dimension_numbers = #tpu.dot_dimension_numbers<[1], [0], [0], [1], [0, 0, 1, 1], [], []>} : vector<8x32xf32>, vector<32x128xf32>, vector<8x128xf32> -> vector<8x128xf32>
    %226 = arith.addf %225, %13 : vector<8x128xf32>
    %227 = arith.index_cast %c0_i32_56 : i32 to index
    %c0_65 = arith.constant 0 : index
    %c0_66 = arith.constant 0 : index
    %228 = vector.load %arg12[%227, %c0_65, %c0_66] : memref<7x8x128xf32, #tpu.memory_space<vmem>>, vector<1x8x128xf32>
    %229 = vector.shape_cast %228 : vector<1x8x128xf32> to vector<8x128xf32>
    %230 = vector.shape_cast %226 : vector<8x128xf32> to vector<1x8x128xf32>
    tpu.vector_store %arg12[%227, %c0_65, %c0_66], %230 {strides = array<i32>} : memref<7x8x128xf32, #tpu.memory_space<vmem>>, vector<1x8x128xf32>,
    %c1_i32_67 = arith.constant 1 : i32
    %231 = arith.index_cast %c1_i32_67 : i32 to index
    %232 = memref.load %arg1[%231] : memref<7xi32, #tpu.memory_space<smem>>
    %c0_i32_68 = arith.constant 0 : i32
    %233 = arith.cmpi ne, %232, %c0_i32_68 : i32
    %234 = arith.extui %233 : i1 to i32
    %235 = arith.sitofp %234 : i32 to f32
    %236 = arith.index_cast %c1_i32_67 : i32 to index
    %c0_69 = arith.constant 0 : index
    %c0_70 = arith.constant 0 : index
    %237 = vector.load %arg3[%236, %c0_69, %c0_70] : memref<7x8x128xf32, #tpu.memory_space<vmem>>, vector<1x8x128xf32>
    %238 = vector.shape_cast %237 : vector<1x8x128xf32> to vector<8x128xf32>
    %239 = vector.broadcast %235 : f32 to vector<8x128xf32>
    %240 = arith.mulf %239, %238 : vector<8x128xf32>
    %cst_71 = arith.constant 1.000000e+00 : f32
    %241 = arith.subf %cst_71, %235 : f32
    %242 = vector.broadcast %241 : f32 to vector<8x128xf32>
    %243 = arith.mulf %242, %226 : vector<8x128xf32>
    %244 = arith.addf %240, %243 : vector<8x128xf32>
    %cst_72 = arith.constant dense<0.000000e+00> : vector<8x128xf32>
    %245 = tpu.matmul %244, %5, %cst_72 {dimension_numbers = #tpu.dot_dimension_numbers<[1], [0], [0], [1], [0, 0, 1, 1], [], []>} : vector<8x128xf32>, vector<128x128xf32>, vector<8x128xf32> -> vector<8x128xf32>
    %cst_73 = arith.constant dense<0.000000e+00> : vector<8x128xf32>
    %246 = tpu.matmul %224, %6, %cst_73 {dimension_numbers = #tpu.dot_dimension_numbers<[1], [0], [0], [1], [0, 0, 1, 1], [], []>} : vector<8x32xf32>, vector<32x128xf32>, vector<8x128xf32> -> vector<8x128xf32>
    %247 = arith.addf %245, %246 : vector<8x128xf32>
    %248 = arith.addf %247, %9 : vector<8x128xf32>
    %249 = arith.negf %248 : vector<8x128xf32>
    %250 = math.exp %249 : vector<8x128xf32>
    %cst_74 = arith.constant 1.000000e+00 : f32
    %251 = vector.broadcast %cst_74 : f32 to vector<8x128xf32>
    %252 = arith.addf %251, %250 : vector<8x128xf32>
    %253 = arith.divf %251, %252 : vector<8x128xf32>
    %254 = math.tanh %248 : vector<8x128xf32>
    %255 = vector.extract_strided_slice %253 {offsets = [0, 0], sizes = [8, 32], strides = [1, 1]} : vector<8x128xf32> to vector<8x32xf32>
    %256 = vector.extract_strided_slice %253 {offsets = [0, 32], sizes = [8, 32], strides = [1, 1]} : vector<8x128xf32> to vector<8x32xf32>
    %257 = vector.extract_strided_slice %254 {offsets = [0, 64], sizes = [8, 32], strides = [1, 1]} : vector<8x128xf32> to vector<8x32xf32>
    %258 = vector.extract_strided_slice %253 {offsets = [0, 96], sizes = [8, 32], strides = [1, 1]} : vector<8x128xf32> to vector<8x32xf32>
    %259 = arith.mulf %256, %222 : vector<8x32xf32>
    %260 = arith.mulf %255, %257 : vector<8x32xf32>
    %261 = arith.addf %259, %260 : vector<8x32xf32>
    %262 = math.tanh %261 : vector<8x32xf32>
    %263 = arith.mulf %258, %262 : vector<8x32xf32>
    %cst_75 = arith.constant dense<0.000000e+00> : vector<8x128xf32>
    %264 = tpu.matmul %263, %10, %cst_75 {dimension_numbers = #tpu.dot_dimension_numbers<[1], [0], [0], [1], [0, 0, 1, 1], [], []>} : vector<8x32xf32>, vector<32x128xf32>, vector<8x128xf32> -> vector<8x128xf32>
    %265 = arith.addf %264, %13 : vector<8x128xf32>
    %266 = arith.index_cast %c1_i32_67 : i32 to index
    %c0_76 = arith.constant 0 : index
    %c0_77 = arith.constant 0 : index
    %267 = vector.load %arg12[%266, %c0_76, %c0_77] : memref<7x8x128xf32, #tpu.memory_space<vmem>>, vector<1x8x128xf32>
    %268 = vector.shape_cast %267 : vector<1x8x128xf32> to vector<8x128xf32>
    %269 = vector.shape_cast %265 : vector<8x128xf32> to vector<1x8x128xf32>
    tpu.vector_store %arg12[%266, %c0_76, %c0_77], %269 {strides = array<i32>} : memref<7x8x128xf32, #tpu.memory_space<vmem>>, vector<1x8x128xf32>,
    %c2_i32_78 = arith.constant 2 : i32
    %270 = arith.index_cast %c2_i32_78 : i32 to index
    %271 = memref.load %arg1[%270] : memref<7xi32, #tpu.memory_space<smem>>
    %c0_i32_79 = arith.constant 0 : i32
    %272 = arith.cmpi ne, %271, %c0_i32_79 : i32
    %273 = arith.extui %272 : i1 to i32
    %274 = arith.sitofp %273 : i32 to f32
    %275 = arith.index_cast %c2_i32_78 : i32 to index
    %c0_80 = arith.constant 0 : index
    %c0_81 = arith.constant 0 : index
    %276 = vector.load %arg3[%275, %c0_80, %c0_81] : memref<7x8x128xf32, #tpu.memory_space<vmem>>, vector<1x8x128xf32>
    %277 = vector.shape_cast %276 : vector<1x8x128xf32> to vector<8x128xf32>
    %278 = vector.broadcast %274 : f32 to vector<8x128xf32>
    %279 = arith.mulf %278, %277 : vector<8x128xf32>
    %cst_82 = arith.constant 1.000000e+00 : f32
    %280 = arith.subf %cst_82, %274 : f32
    %281 = vector.broadcast %280 : f32 to vector<8x128xf32>
    %282 = arith.mulf %281, %265 : vector<8x128xf32>
    %283 = arith.addf %279, %282 : vector<8x128xf32>
    %cst_83 = arith.constant dense<0.000000e+00> : vector<8x128xf32>
    %284 = tpu.matmul %283, %5, %cst_83 {dimension_numbers = #tpu.dot_dimension_numbers<[1], [0], [0], [1], [0, 0, 1, 1], [], []>} : vector<8x128xf32>, vector<128x128xf32>, vector<8x128xf32> -> vector<8x128xf32>
    %cst_84 = arith.constant dense<0.000000e+00> : vector<8x128xf32>
    %285 = tpu.matmul %263, %6, %cst_84 {dimension_numbers = #tpu.dot_dimension_numbers<[1], [0], [0], [1], [0, 0, 1, 1], [], []>} : vector<8x32xf32>, vector<32x128xf32>, vector<8x128xf32> -> vector<8x128xf32>
    %286 = arith.addf %284, %285 : vector<8x128xf32>
    %287 = arith.addf %286, %9 : vector<8x128xf32>
    %288 = arith.negf %287 : vector<8x128xf32>
    %289 = math.exp %288 : vector<8x128xf32>
    %cst_85 = arith.constant 1.000000e+00 : f32
    %290 = vector.broadcast %cst_85 : f32 to vector<8x128xf32>
    %291 = arith.addf %290, %289 : vector<8x128xf32>
    %292 = arith.divf %290, %291 : vector<8x128xf32>
    %293 = math.tanh %287 : vector<8x128xf32>
    %294 = vector.extract_strided_slice %292 {offsets = [0, 0], sizes = [8, 32], strides = [1, 1]} : vector<8x128xf32> to vector<8x32xf32>
    %295 = vector.extract_strided_slice %292 {offsets = [0, 32], sizes = [8, 32], strides = [1, 1]} : vector<8x128xf32> to vector<8x32xf32>
    %296 = vector.extract_strided_slice %293 {offsets = [0, 64], sizes = [8, 32], strides = [1, 1]} : vector<8x128xf32> to vector<8x32xf32>
    %297 = vector.extract_strided_slice %292 {offsets = [0, 96], sizes = [8, 32], strides = [1, 1]} : vector<8x128xf32> to vector<8x32xf32>
    %298 = arith.mulf %295, %261 : vector<8x32xf32>
    %299 = arith.mulf %294, %296 : vector<8x32xf32>
    %300 = arith.addf %298, %299 : vector<8x32xf32>
    %301 = math.tanh %300 : vector<8x32xf32>
    %302 = arith.mulf %297, %301 : vector<8x32xf32>
    %cst_86 = arith.constant dense<0.000000e+00> : vector<8x128xf32>
    %303 = tpu.matmul %302, %10, %cst_86 {dimension_numbers = #tpu.dot_dimension_numbers<[1], [0], [0], [1], [0, 0, 1, 1], [], []>} : vector<8x32xf32>, vector<32x128xf32>, vector<8x128xf32> -> vector<8x128xf32>
    %304 = arith.addf %303, %13 : vector<8x128xf32>
    %305 = arith.index_cast %c2_i32_78 : i32 to index
    %c0_87 = arith.constant 0 : index
    %c0_88 = arith.constant 0 : index
    %306 = vector.load %arg12[%305, %c0_87, %c0_88] : memref<7x8x128xf32, #tpu.memory_space<vmem>>, vector<1x8x128xf32>
    %307 = vector.shape_cast %306 : vector<1x8x128xf32> to vector<8x128xf32>
    %308 = vector.shape_cast %304 : vector<8x128xf32> to vector<1x8x128xf32>
    tpu.vector_store %arg12[%305, %c0_87, %c0_88], %308 {strides = array<i32>} : memref<7x8x128xf32, #tpu.memory_space<vmem>>, vector<1x8x128xf32>,
    %c3_i32_89 = arith.constant 3 : i32
    %309 = arith.index_cast %c3_i32_89 : i32 to index
    %310 = memref.load %arg1[%309] : memref<7xi32, #tpu.memory_space<smem>>
    %c0_i32_90 = arith.constant 0 : i32
    %311 = arith.cmpi ne, %310, %c0_i32_90 : i32
    %312 = arith.extui %311 : i1 to i32
    %313 = arith.sitofp %312 : i32 to f32
    %314 = arith.index_cast %c3_i32_89 : i32 to index
    %c0_91 = arith.constant 0 : index
    %c0_92 = arith.constant 0 : index
    %315 = vector.load %arg3[%314, %c0_91, %c0_92] : memref<7x8x128xf32, #tpu.memory_space<vmem>>, vector<1x8x128xf32>
    %316 = vector.shape_cast %315 : vector<1x8x128xf32> to vector<8x128xf32>
    %317 = vector.broadcast %313 : f32 to vector<8x128xf32>
    %318 = arith.mulf %317, %316 : vector<8x128xf32>
    %cst_93 = arith.constant 1.000000e+00 : f32
    %319 = arith.subf %cst_93, %313 : f32
    %320 = vector.broadcast %319 : f32 to vector<8x128xf32>
    %321 = arith.mulf %320, %304 : vector<8x128xf32>
    %322 = arith.addf %318, %321 : vector<8x128xf32>
    %cst_94 = arith.constant dense<0.000000e+00> : vector<8x128xf32>
    %323 = tpu.matmul %322, %5, %cst_94 {dimension_numbers = #tpu.dot_dimension_numbers<[1], [0], [0], [1], [0, 0, 1, 1], [], []>} : vector<8x128xf32>, vector<128x128xf32>, vector<8x128xf32> -> vector<8x128xf32>
    %cst_95 = arith.constant dense<0.000000e+00> : vector<8x128xf32>
    %324 = tpu.matmul %302, %6, %cst_95 {dimension_numbers = #tpu.dot_dimension_numbers<[1], [0], [0], [1], [0, 0, 1, 1], [], []>} : vector<8x32xf32>, vector<32x128xf32>, vector<8x128xf32> -> vector<8x128xf32>
    %325 = arith.addf %323, %324 : vector<8x128xf32>
    %326 = arith.addf %325, %9 : vector<8x128xf32>
    %327 = arith.negf %326 : vector<8x128xf32>
    %328 = math.exp %327 : vector<8x128xf32>
    %cst_96 = arith.constant 1.000000e+00 : f32
    %329 = vector.broadcast %cst_96 : f32 to vector<8x128xf32>
    %330 = arith.addf %329, %328 : vector<8x128xf32>
    %331 = arith.divf %329, %330 : vector<8x128xf32>
    %332 = math.tanh %326 : vector<8x128xf32>
    %333 = vector.extract_strided_slice %331 {offsets = [0, 0], sizes = [8, 32], strides = [1, 1]} : vector<8x128xf32> to vector<8x32xf32>
    %334 = vector.extract_strided_slice %331 {offsets = [0, 32], sizes = [8, 32], strides = [1, 1]} : vector<8x128xf32> to vector<8x32xf32>
    %335 = vector.extract_strided_slice %332 {offsets = [0, 64], sizes = [8, 32], strides = [1, 1]} : vector<8x128xf32> to vector<8x32xf32>
    %336 = vector.extract_strided_slice %331 {offsets = [0, 96], sizes = [8, 32], strides = [1, 1]} : vector<8x128xf32> to vector<8x32xf32>
    %337 = arith.mulf %334, %300 : vector<8x32xf32>
    %338 = arith.mulf %333, %335 : vector<8x32xf32>
    %339 = arith.addf %337, %338 : vector<8x32xf32>
    %340 = math.tanh %339 : vector<8x32xf32>
    %341 = arith.mulf %336, %340 : vector<8x32xf32>
    %cst_97 = arith.constant dense<0.000000e+00> : vector<8x128xf32>
    %342 = tpu.matmul %341, %10, %cst_97 {dimension_numbers = #tpu.dot_dimension_numbers<[1], [0], [0], [1], [0, 0, 1, 1], [], []>} : vector<8x32xf32>, vector<32x128xf32>, vector<8x128xf32> -> vector<8x128xf32>
    %343 = arith.addf %342, %13 : vector<8x128xf32>
    %344 = arith.index_cast %c3_i32_89 : i32 to index
    %c0_98 = arith.constant 0 : index
    %c0_99 = arith.constant 0 : index
    %345 = vector.load %arg12[%344, %c0_98, %c0_99] : memref<7x8x128xf32, #tpu.memory_space<vmem>>, vector<1x8x128xf32>
    %346 = vector.shape_cast %345 : vector<1x8x128xf32> to vector<8x128xf32>
    %347 = vector.shape_cast %343 : vector<8x128xf32> to vector<1x8x128xf32>
    tpu.vector_store %arg12[%344, %c0_98, %c0_99], %347 {strides = array<i32>} : memref<7x8x128xf32, #tpu.memory_space<vmem>>, vector<1x8x128xf32>,
    %c4_i32_100 = arith.constant 4 : i32
    %348 = arith.index_cast %c4_i32_100 : i32 to index
    %349 = memref.load %arg1[%348] : memref<7xi32, #tpu.memory_space<smem>>
    %c0_i32_101 = arith.constant 0 : i32
    %350 = arith.cmpi ne, %349, %c0_i32_101 : i32
    %351 = arith.extui %350 : i1 to i32
    %352 = arith.sitofp %351 : i32 to f32
    %353 = arith.index_cast %c4_i32_100 : i32 to index
    %c0_102 = arith.constant 0 : index
    %c0_103 = arith.constant 0 : index
    %354 = vector.load %arg3[%353, %c0_102, %c0_103] : memref<7x8x128xf32, #tpu.memory_space<vmem>>, vector<1x8x128xf32>
    %355 = vector.shape_cast %354 : vector<1x8x128xf32> to vector<8x128xf32>
    %356 = vector.broadcast %352 : f32 to vector<8x128xf32>
    %357 = arith.mulf %356, %355 : vector<8x128xf32>
    %cst_104 = arith.constant 1.000000e+00 : f32
    %358 = arith.subf %cst_104, %352 : f32
    %359 = vector.broadcast %358 : f32 to vector<8x128xf32>
    %360 = arith.mulf %359, %343 : vector<8x128xf32>
    %361 = arith.addf %357, %360 : vector<8x128xf32>
    %cst_105 = arith.constant dense<0.000000e+00> : vector<8x128xf32>
    %362 = tpu.matmul %361, %5, %cst_105 {dimension_numbers = #tpu.dot_dimension_numbers<[1], [0], [0], [1], [0, 0, 1, 1], [], []>} : vector<8x128xf32>, vector<128x128xf32>, vector<8x128xf32> -> vector<8x128xf32>
    %cst_106 = arith.constant dense<0.000000e+00> : vector<8x128xf32>
    %363 = tpu.matmul %341, %6, %cst_106 {dimension_numbers = #tpu.dot_dimension_numbers<[1], [0], [0], [1], [0, 0, 1, 1], [], []>} : vector<8x32xf32>, vector<32x128xf32>, vector<8x128xf32> -> vector<8x128xf32>
    %364 = arith.addf %362, %363 : vector<8x128xf32>
    %365 = arith.addf %364, %9 : vector<8x128xf32>
    %366 = arith.negf %365 : vector<8x128xf32>
    %367 = math.exp %366 : vector<8x128xf32>
    %cst_107 = arith.constant 1.000000e+00 : f32
    %368 = vector.broadcast %cst_107 : f32 to vector<8x128xf32>
    %369 = arith.addf %368, %367 : vector<8x128xf32>
    %370 = arith.divf %368, %369 : vector<8x128xf32>
    %371 = math.tanh %365 : vector<8x128xf32>
    %372 = vector.extract_strided_slice %370 {offsets = [0, 0], sizes = [8, 32], strides = [1, 1]} : vector<8x128xf32> to vector<8x32xf32>
    %373 = vector.extract_strided_slice %370 {offsets = [0, 32], sizes = [8, 32], strides = [1, 1]} : vector<8x128xf32> to vector<8x32xf32>
    %374 = vector.extract_strided_slice %371 {offsets = [0, 64], sizes = [8, 32], strides = [1, 1]} : vector<8x128xf32> to vector<8x32xf32>
    %375 = vector.extract_strided_slice %370 {offsets = [0, 96], sizes = [8, 32], strides = [1, 1]} : vector<8x128xf32> to vector<8x32xf32>
    %376 = arith.mulf %373, %339 : vector<8x32xf32>
    %377 = arith.mulf %372, %374 : vector<8x32xf32>
    %378 = arith.addf %376, %377 : vector<8x32xf32>
    %379 = math.tanh %378 : vector<8x32xf32>
    %380 = arith.mulf %375, %379 : vector<8x32xf32>
    %cst_108 = arith.constant dense<0.000000e+00> : vector<8x128xf32>
    %381 = tpu.matmul %380, %10, %cst_108 {dimension_numbers = #tpu.dot_dimension_numbers<[1], [0], [0], [1], [0, 0, 1, 1], [], []>} : vector<8x32xf32>, vector<32x128xf32>, vector<8x128xf32> -> vector<8x128xf32>
    %382 = arith.addf %381, %13 : vector<8x128xf32>
    %383 = arith.index_cast %c4_i32_100 : i32 to index
    %c0_109 = arith.constant 0 : index
    %c0_110 = arith.constant 0 : index
    %384 = vector.load %arg12[%383, %c0_109, %c0_110] : memref<7x8x128xf32, #tpu.memory_space<vmem>>, vector<1x8x128xf32>
    %385 = vector.shape_cast %384 : vector<1x8x128xf32> to vector<8x128xf32>
    %386 = vector.shape_cast %382 : vector<8x128xf32> to vector<1x8x128xf32>
    tpu.vector_store %arg12[%383, %c0_109, %c0_110], %386 {strides = array<i32>} : memref<7x8x128xf32, #tpu.memory_space<vmem>>, vector<1x8x128xf32>,
    %c5_i32_111 = arith.constant 5 : i32
    %387 = arith.index_cast %c5_i32_111 : i32 to index
    %388 = memref.load %arg1[%387] : memref<7xi32, #tpu.memory_space<smem>>
    %c0_i32_112 = arith.constant 0 : i32
    %389 = arith.cmpi ne, %388, %c0_i32_112 : i32
    %390 = arith.extui %389 : i1 to i32
    %391 = arith.sitofp %390 : i32 to f32
    %392 = arith.index_cast %c5_i32_111 : i32 to index
    %c0_113 = arith.constant 0 : index
    %c0_114 = arith.constant 0 : index
    %393 = vector.load %arg3[%392, %c0_113, %c0_114] : memref<7x8x128xf32, #tpu.memory_space<vmem>>, vector<1x8x128xf32>
    %394 = vector.shape_cast %393 : vector<1x8x128xf32> to vector<8x128xf32>
    %395 = vector.broadcast %391 : f32 to vector<8x128xf32>
    %396 = arith.mulf %395, %394 : vector<8x128xf32>
    %cst_115 = arith.constant 1.000000e+00 : f32
    %397 = arith.subf %cst_115, %391 : f32
    %398 = vector.broadcast %397 : f32 to vector<8x128xf32>
    %399 = arith.mulf %398, %382 : vector<8x128xf32>
    %400 = arith.addf %396, %399 : vector<8x128xf32>
    %cst_116 = arith.constant dense<0.000000e+00> : vector<8x128xf32>
    %401 = tpu.matmul %400, %5, %cst_116 {dimension_numbers = #tpu.dot_dimension_numbers<[1], [0], [0], [1], [0, 0, 1, 1], [], []>} : vector<8x128xf32>, vector<128x128xf32>, vector<8x128xf32> -> vector<8x128xf32>
    %cst_117 = arith.constant dense<0.000000e+00> : vector<8x128xf32>
    %402 = tpu.matmul %380, %6, %cst_117 {dimension_numbers = #tpu.dot_dimension_numbers<[1], [0], [0], [1], [0, 0, 1, 1], [], []>} : vector<8x32xf32>, vector<32x128xf32>, vector<8x128xf32> -> vector<8x128xf32>
    %403 = arith.addf %401, %402 : vector<8x128xf32>
    %404 = arith.addf %403, %9 : vector<8x128xf32>
    %405 = arith.negf %404 : vector<8x128xf32>
    %406 = math.exp %405 : vector<8x128xf32>
    %cst_118 = arith.constant 1.000000e+00 : f32
    %407 = vector.broadcast %cst_118 : f32 to vector<8x128xf32>
    %408 = arith.addf %407, %406 : vector<8x128xf32>
    %409 = arith.divf %407, %408 : vector<8x128xf32>
    %410 = math.tanh %404 : vector<8x128xf32>
    %411 = vector.extract_strided_slice %409 {offsets = [0, 0], sizes = [8, 32], strides = [1, 1]} : vector<8x128xf32> to vector<8x32xf32>
    %412 = vector.extract_strided_slice %409 {offsets = [0, 32], sizes = [8, 32], strides = [1, 1]} : vector<8x128xf32> to vector<8x32xf32>
    %413 = vector.extract_strided_slice %410 {offsets = [0, 64], sizes = [8, 32], strides = [1, 1]} : vector<8x128xf32> to vector<8x32xf32>
    %414 = vector.extract_strided_slice %409 {offsets = [0, 96], sizes = [8, 32], strides = [1, 1]} : vector<8x128xf32> to vector<8x32xf32>
    %415 = arith.mulf %412, %378 : vector<8x32xf32>
    %416 = arith.mulf %411, %413 : vector<8x32xf32>
    %417 = arith.addf %415, %416 : vector<8x32xf32>
    %418 = math.tanh %417 : vector<8x32xf32>
    %419 = arith.mulf %414, %418 : vector<8x32xf32>
    %cst_119 = arith.constant dense<0.000000e+00> : vector<8x128xf32>
    %420 = tpu.matmul %419, %10, %cst_119 {dimension_numbers = #tpu.dot_dimension_numbers<[1], [0], [0], [1], [0, 0, 1, 1], [], []>} : vector<8x32xf32>, vector<32x128xf32>, vector<8x128xf32> -> vector<8x128xf32>
    %421 = arith.addf %420, %13 : vector<8x128xf32>
    %422 = arith.index_cast %c5_i32_111 : i32 to index
    %c0_120 = arith.constant 0 : index
    %c0_121 = arith.constant 0 : index
    %423 = vector.load %arg12[%422, %c0_120, %c0_121] : memref<7x8x128xf32, #tpu.memory_space<vmem>>, vector<1x8x128xf32>
    %424 = vector.shape_cast %423 : vector<1x8x128xf32> to vector<8x128xf32>
    %425 = vector.shape_cast %421 : vector<8x128xf32> to vector<1x8x128xf32>
    tpu.vector_store %arg12[%422, %c0_120, %c0_121], %425 {strides = array<i32>} : memref<7x8x128xf32, #tpu.memory_space<vmem>>, vector<1x8x128xf32>,
    %c6_i32_122 = arith.constant 6 : i32
    %426 = arith.index_cast %c6_i32_122 : i32 to index
    %427 = memref.load %arg1[%426] : memref<7xi32, #tpu.memory_space<smem>>
    %c0_i32_123 = arith.constant 0 : i32
    %428 = arith.cmpi ne, %427, %c0_i32_123 : i32
    %429 = arith.extui %428 : i1 to i32
    %430 = arith.sitofp %429 : i32 to f32
    %431 = arith.index_cast %c6_i32_122 : i32 to index
    %c0_124 = arith.constant 0 : index
    %c0_125 = arith.constant 0 : index
    %432 = vector.load %arg3[%431, %c0_124, %c0_125] : memref<7x8x128xf32, #tpu.memory_space<vmem>>, vector<1x8x128xf32>
    %433 = vector.shape_cast %432 : vector<1x8x128xf32> to vector<8x128xf32>
    %434 = vector.broadcast %430 : f32 to vector<8x128xf32>
    %435 = arith.mulf %434, %433 : vector<8x128xf32>
    %cst_126 = arith.constant 1.000000e+00 : f32
    %436 = arith.subf %cst_126, %430 : f32
    %437 = vector.broadcast %436 : f32 to vector<8x128xf32>
    %438 = arith.mulf %437, %421 : vector<8x128xf32>
    %439 = arith.addf %435, %438 : vector<8x128xf32>
    %cst_127 = arith.constant dense<0.000000e+00> : vector<8x128xf32>
    %440 = tpu.matmul %439, %5, %cst_127 {dimension_numbers = #tpu.dot_dimension_numbers<[1], [0], [0], [1], [0, 0, 1, 1], [], []>} : vector<8x128xf32>, vector<128x128xf32>, vector<8x128xf32> -> vector<8x128xf32>
    %cst_128 = arith.constant dense<0.000000e+00> : vector<8x128xf32>
    %441 = tpu.matmul %419, %6, %cst_128 {dimension_numbers = #tpu.dot_dimension_numbers<[1], [0], [0], [1], [0, 0, 1, 1], [], []>} : vector<8x32xf32>, vector<32x128xf32>, vector<8x128xf32> -> vector<8x128xf32>
    %442 = arith.addf %440, %441 : vector<8x128xf32>
    %443 = arith.addf %442, %9 : vector<8x128xf32>
    %444 = arith.negf %443 : vector<8x128xf32>
    %445 = math.exp %444 : vector<8x128xf32>
    %cst_129 = arith.constant 1.000000e+00 : f32
    %446 = vector.broadcast %cst_129 : f32 to vector<8x128xf32>
    %447 = arith.addf %446, %445 : vector<8x128xf32>
    %448 = arith.divf %446, %447 : vector<8x128xf32>
    %449 = math.tanh %443 : vector<8x128xf32>
    %450 = vector.extract_strided_slice %448 {offsets = [0, 0], sizes = [8, 32], strides = [1, 1]} : vector<8x128xf32> to vector<8x32xf32>
    %451 = vector.extract_strided_slice %448 {offsets = [0, 32], sizes = [8, 32], strides = [1, 1]} : vector<8x128xf32> to vector<8x32xf32>
    %452 = vector.extract_strided_slice %449 {offsets = [0, 64], sizes = [8, 32], strides = [1, 1]} : vector<8x128xf32> to vector<8x32xf32>
    %453 = vector.extract_strided_slice %448 {offsets = [0, 96], sizes = [8, 32], strides = [1, 1]} : vector<8x128xf32> to vector<8x32xf32>
    %454 = arith.mulf %451, %417 : vector<8x32xf32>
    %455 = arith.mulf %450, %452 : vector<8x32xf32>
    %456 = arith.addf %454, %455 : vector<8x32xf32>
    %457 = math.tanh %456 : vector<8x32xf32>
    %458 = arith.mulf %453, %457 : vector<8x32xf32>
    %cst_130 = arith.constant dense<0.000000e+00> : vector<8x128xf32>
    %459 = tpu.matmul %458, %10, %cst_130 {dimension_numbers = #tpu.dot_dimension_numbers<[1], [0], [0], [1], [0, 0, 1, 1], [], []>} : vector<8x32xf32>, vector<32x128xf32>, vector<8x128xf32> -> vector<8x128xf32>
    %460 = arith.addf %459, %13 : vector<8x128xf32>
    %461 = arith.index_cast %c6_i32_122 : i32 to index
    %c0_131 = arith.constant 0 : index
    %c0_132 = arith.constant 0 : index
    %462 = vector.load %arg12[%461, %c0_131, %c0_132] : memref<7x8x128xf32, #tpu.memory_space<vmem>>, vector<1x8x128xf32>
    %463 = vector.shape_cast %462 : vector<1x8x128xf32> to vector<8x128xf32>
    %464 = vector.shape_cast %460 : vector<8x128xf32> to vector<1x8x128xf32>
    tpu.vector_store %arg12[%461, %c0_131, %c0_132], %464 {strides = array<i32>} : memref<7x8x128xf32, #tpu.memory_space<vmem>>, vector<1x8x128xf32>,
    %c7_i32_133 = arith.constant 7 : i32
    return
  }
  func.func @transform_0(%arg0: i32, %arg1: memref<7xi32, #tpu.memory_space<smem>>) -> (i32, i32, i32) {
    %c0_i32 = arith.constant 0 : i32
    %c0_i32_0 = arith.constant 0 : i32
    %c0_i32_1 = arith.constant 0 : i32
    %c0_i32_2 = arith.constant 0 : i32
    return %c0_i32, %c0_i32_0, %c0_i32_1 : i32, i32, i32
  }
  func.func @transform_1(%arg0: i32, %arg1: memref<7xi32, #tpu.memory_space<smem>>) -> (i32, i32, i32) {
    %c0_i32 = arith.constant 0 : i32
    %c0_i32_0 = arith.constant 0 : i32
    %c0_i32_1 = arith.constant 0 : i32
    %c0_i32_2 = arith.constant 0 : i32
    return %c0_i32, %c0_i32_0, %c0_i32_1 : i32, i32, i32
  }
  func.func @transform_2(%arg0: i32, %arg1: memref<7xi32, #tpu.memory_space<smem>>) -> (i32, i32) {
    %c0_i32 = arith.constant 0 : i32
    %c0_i32_0 = arith.constant 0 : i32
    %c0_i32_1 = arith.constant 0 : i32
    return %c0_i32, %c0_i32_0 : i32, i32
  }
  func.func @transform_3(%arg0: i32, %arg1: memref<7xi32, #tpu.memory_space<smem>>) -> (i32, i32) {
    %c0_i32 = arith.constant 0 : i32
    %c0_i32_0 = arith.constant 0 : i32
    %c0_i32_1 = arith.constant 0 : i32
    return %c0_i32, %c0_i32_0 : i32, i32
  }
  func.func @transform_4(%arg0: i32, %arg1: memref<7xi32, #tpu.memory_space<smem>>) -> (i32, i32) {
    %c0_i32 = arith.constant 0 : i32
    %c0_i32_0 = arith.constant 0 : i32
    %c0_i32_1 = arith.constant 0 : i32
    return %c0_i32, %c0_i32_0 : i32, i32
  }
  func.func @transform_5(%arg0: i32, %arg1: memref<7xi32, #tpu.memory_space<smem>>) -> (i32, i32) {
    %c0_i32 = arith.constant 0 : i32
    %c0_i32_0 = arith.constant 0 : i32
    %c0_i32_1 = arith.constant 0 : i32
    return %c0_i32, %c0_i32_0 : i32, i32
  }
  func.func @transform_6(%arg0: i32, %arg1: memref<7xi32, #tpu.memory_space<smem>>) -> (i32, i32) {
    %c0_i32 = arith.constant 0 : i32
    %c0_i32_0 = arith.constant 0 : i32
    %c0_i32_1 = arith.constant 0 : i32
    return %c0_i32, %c0_i32_0 : i32, i32
  }
  func.func @transform_7(%arg0: i32, %arg1: memref<7xi32, #tpu.memory_space<smem>>) -> (i32, i32) {
    %c0_i32 = arith.constant 0 : i32
    %c0_i32_0 = arith.constant 0 : i32
    %c0_i32_1 = arith.constant 0 : i32
    return %c0_i32, %c0_i32_0 : i32, i32
  }
  func.func @transform_8(%arg0: i32, %arg1: memref<7xi32, #tpu.memory_space<smem>>) -> (i32, i32) {
    %c0_i32 = arith.constant 0 : i32
    %c0_i32_0 = arith.constant 0 : i32
    %c0_i32_1 = arith.constant 0 : i32
    return %c0_i32, %c0_i32_0 : i32, i32
  }
  func.func @transform_9(%arg0: i32, %arg1: memref<7xi32, #tpu.memory_space<smem>>) -> (i32, i32) {
    %c0_i32 = arith.constant 0 : i32
    %c0_i32_0 = arith.constant 0 : i32
    %c0_i32_1 = arith.constant 0 : i32
    return %c0_i32, %c0_i32_0 : i32, i32
  }
  func.func @transform_10(%arg0: i32, %arg1: memref<7xi32, #tpu.memory_space<smem>>) -> (i32, i32, i32) {
    %c0_i32 = arith.constant 0 : i32
    %c0_i32_0 = arith.constant 0 : i32
    %c0_i32_1 = arith.constant 0 : i32
    %c0_i32_2 = arith.constant 0 : i32
    return %c0_i32, %c0_i32_0, %c0_i32_1 : i32, i32, i32
  }
}

</mosaic_0001>

<bundles_post_ra>
// kernel: seq2seq_forward.1
= control target key start
LH: loop header
LB: loop body
LE: loop exit
PB: predicated region body
PF: predicated region fallthrough
CT: control target
= control target key end

     0   :  { %s1871_s20 = smov [#allocation3]   ;;  %s2528_s0 = inlined_call_operand.vmem [shape: s32[7], index: 0, kind: input, shape index: {}]   ;;  %s2529_s1 = inlined_call_operand.vmem [shape: f32[8,8,16], index: 1, kind: input, shape index: {}]   ;;  %s2530_s2 = inlined_call_operand.vmem [shape: f32[7,8,128], index: 2, kind: input, shape index: {}]   ;;  %s2531_s3 = inlined_call_operand.hbm [shape: f32[16,128], index: 3, kind: input, shape index: {}]   ;;  %s2532_s4 = inlined_call_operand.vmem [shape: f32[32,128], index: 4, kind: input, shape index: {}]   ;;  %s2533_s5 = inlined_call_operand.vmem [shape: f32[1,128], index: 5, kind: input, shape index: {}]   ;;  %s2534_s6 = inlined_call_operand.vmem [shape: f32[128,128], index: 6, kind: input, shape index: {}]   ;;  %s2535_s7 = inlined_call_operand.vmem [shape: f32[32,128], index: 7, kind: input, shape index: {}]   ;;  %s2536_s8 = inlined_call_operand.vmem [shape: f32[1,128], index: 8, kind: input, shape index: {}]   ;;  %s2537_s9 = inlined_call_operand.vmem [shape: f32[32,128], index: 9, kind: input, shape index: {}]   ;;  %s2538_s10 = inlined_call_operand.vmem [shape: f32[1,128], index: 10, kind: input, shape index: {}]   ;;  %s2539_s11 = inlined_call_operand.vmem [shape: f32[7,8,128], index: 11, kind: output, shape index: {}]  }
   0x1   :  { %s17_s19 = sshll.u32 %s2528_s0, 4  ;;  %s18_s19 = int_to_ptr.vmem [resolvable:$true] %s17_s19 }
   0x2   :  { %20 = dma.vmem_to_smem %s18_s19, 16, %s1871_s20, [#allocation2] }
   0x3   :  { %1867 = dma.done.wait [#allocation2], 16 }
   0x4   :  { %1868 = vsyncadd [#allocation2], 4294967280 }
   0x5   :  { %23 = sfence }
   0x6   :  { %24 = vsyncpa [#allocation5], 0  ;;  %s33_s23 = sshll.u32 %s2531_s3, 4  ;;  %s1872_s24 = smov [#allocation4]   ;;  %s34_s23 = int_to_ptr.hbm [resolvable:$true] %s33_s23 }
   0x7   :  { %s35_s25 = sshll.u32 %s1872_s24, 4  ;;  %s1873_s26 = smov 128   ;;  %s36_s25 = int_to_ptr.vmem [resolvable:$true] %s35_s25 }
   0x8   :  { %s1874_s27 = smov 8  }
   0x9   :  { %41 = dma.hbm_to_vmem [thread:$0]  %s34_s23, 256, %s36_s25, [#allocation5], %s1873_s26, %s1873_s26, %s1874_s27  }
   0xa   :  { %1869 = dma.done.wait [#allocation5], 256  }
   0xb   :  { %1870 = vsyncadd [#allocation5], 4294967040  ;;  %v1947_v0 = vld [vmem:[%s2532_s4 + $0x18] sm:$0xff]  ;;  %v1952_v1 = vld [vmem:[%s2532_s4 + $0x10] sm:$0xff]  ;;  %vm127_vm0 = vcmask 130048   ;;  %v1875_v7 = vmov 0.0  }
   0xc   :  { %119 = vmatpush.msra.mxu2 %v1947_v0  ;;  %v1958_v2 = vld [vmem:[%s2532_s4 + $0x8] sm:$0xff]  ;;  %v1962_v4 = vld [vmem:[#allocation4] sm:$0xff]  ;;  %560 = vmatpush.msra.mxu0 %v1947_v0  ;;  %s1876_s18 = smov 64   ;;  %vm103_vm5 = vcmask 261120   ;;  %v1638_v61 = vld [vmem:[%s2529_s1 + $0x10] sm:$0xff]  ;;  %s1677_s12 = sld [smem:[#allocation3 + $0x3]] }
   0xd   :  { %v1960_v3 = vld [vmem:[#allocation4 + $0x8] sm:$0xff]  ;;  %v102_v5 = vld [vmem:[%s2529_s1] sm:$0xff]  ;;  %s1683_s17 = sld [smem:[#allocation3 + $0x4]] }
   0xe   :  { %145 = vmatpush.msra.mxu1 %v1960_v3  ;;  %233 = vmatpush.msra.mxu3 %v1960_v3  ;;  %v1975_v6 = vld [vmem:[%s2532_s4] sm:$0xff]  ;;  %v1634_v35 = vld [vmem:[%s2529_s1 + $0x8] sm:$0xff]  ;;  %s1689_s25 = sld [smem:[#allocation3 + $0x5]] }
   0xf   :  { %120 = vmatpush.msra.mxu2 %v1952_v1  ;;  %561 = vmatpush.msra.mxu0 %v1952_v1  ;;  %v2007_v9 = vld [vmem:[%s2533_s5] ss:$0 sm:$0xff]  ;;  %s1877_s5 = smov 32   ;;  %s1695_s3 = sld [smem:[#allocation3 + $0x6]] }
  0x10   :  { %146 = vmatpush.msra.mxu1 %v1962_v4  ;;  %234 = vmatpush.msra.mxu3 %v1962_v4 }
  0x11   :  { %121 = vmatpush.msra.mxu2 %v1958_v2  ;;  %1632 = vmatmul.msk.f32.vlgmr.msra.gmra.mxu1 %vm127_vm0, %v102_v5 }
  0x12   :  { %321 = vmatpush.msrb.mxu3 %v1960_v3  ;;  %296 = vmatpush.msrb.mxu1 %v1947_v0  ;;  %p1160_p3 = scmp.ne.s32.totalorder %s1677_s12, 0 }
  0x13   :  { %122 = vmatpush.msra.mxu2 %v1975_v6  ;;  %562 = vmatpush.msra.mxu0 %v1958_v2  ;;  %p1277_p4 = scmp.ne.s32.totalorder %s1683_s17, 0 }
  0x14   :  { %123 = vmatmul.f32.vlgmr.msra.gmra.mxu2 %v1875_v7  ;;  %322 = vmatpush.msrb.mxu3 %v1962_v4  ;;  %p1394_p5 = scmp.ne.s32.totalorder %s1689_s25, 0 }
  0x15   :  { %208 = vmatpush.msrb.mxu2 %v1947_v0  ;;  %297 = vmatpush.msrb.mxu1 %v1952_v1  ;;  %p1511_p6 = scmp.ne.s32.totalorder %s1695_s3, 0 }
  0x16   :  { %563 = vmatpush.msra.mxu0 %v1975_v6  ;;  %1636 = vmatmul.msk.f32.vlgmr.msra.gmra.mxu3 %vm127_vm0, %v1634_v35  ;;  %s1395_s26 = scalar_select %p1394_p5, 1, 0 }
  0x17   :  { %209 = vmatpush.msrb.mxu2 %v1952_v1  ;;  %298 = vmatpush.msrb.mxu1 %v1958_v2 }
  0x18   :  { %736 = vmatpush.msrb.mxu0 %v1947_v0  ;;  %384 = vmatpush.msra.mxu3 %v1947_v0  ;;  %s1396_s27 = scvt.s32.f32 %s1395_s26 }
  0x19   :  { %210 = vmatpush.msrb.mxu2 %v1958_v2  ;;  %299 = vmatpush.msrb.mxu1 %v1975_v6 }
  0x1a   :  { %737 = vmatpush.msrb.mxu0 %v1952_v1  ;;  %385 = vmatpush.msra.mxu3 %v1952_v1 }
  0x1b   :  { %472 = vmatpush.msra.mxu1 %v1947_v0  ;;  %211 = vmatpush.msrb.mxu2 %v1975_v6 }
  0x1c   :  { %738 = vmatpush.msrb.mxu0 %v1958_v2  ;;  %386 = vmatpush.msra.mxu3 %v1958_v2 }
  0x1d   :  { %409 = vmatpush.msra.mxu2 %v1960_v3  ;;  %473 = vmatpush.msra.mxu1 %v1952_v1 }
  0x1e   :  { %739 = vmatpush.msrb.mxu0 %v1975_v6  ;;  %387 = vmatpush.msra.mxu3 %v1975_v6 }
  0x1f   :  { %410 = vmatpush.msra.mxu2 %v1962_v4  ;;  %474 = vmatpush.msra.mxu1 %v1958_v2 }
  0x20   :  { %1640 = vmatmul.msk.f32.vlgmr.msrb.gmra.mxu3 %vm127_vm0, %v1638_v61 }
  0x21   :  { %475 = vmatpush.msra.mxu1 %v1975_v6  ;;  %497 = vmatpush.msrb.mxu3 %v1960_v3 }
  0x23   :  { %498 = vmatpush.msrb.mxu3 %v1962_v4 }
  0x8e   :  { %v148_v8 = vpop.f32.mrf.mxu1 }
  0x97   :  { %v124_v10 = vpop.f32.mrf.mxu2 }
  0x98   :  { %v149_v11 = vadd.f32 %v148_v8, %v124_v10 }
  0x99   :  { %v236_v37 = vpop.f32.mrf.mxu3 }
  0x9a   :  { %v151_v12 = vadd.f32 %v2007_v9, %v149_v11 }
  0x9c   :  { %1711 = vtanh.f32 %v151_v12  ;;  %v1633_v14 = vmul.f32 -1.442695, %v151_v12 }
  0x9e   :  { %1713 = vpow2.f32 %v1633_v14 }
  0xa2   :  { %v1712_v13 = vpop.eup %1711 }
  0xa3   :  { %174 = vrot.lane.b32.xlu0 %v1712_v13, %s1876_s18  ;;  %v324_v7 = vpop.f32.mrf.mxu3 }
  0xa4   :  { %v1714_v15 = vpop.eup %1713 }
  0xa5   :  { %v155_v16 = vadd.f32 1.0, %v1714_v15 }
  0xa7   :  { %1715 = vrcp.f32 %v155_v16  ;;  %v167_v22 = vand.u32 2147483648, %v155_v16  ;;  %vm161_vm2 = vweird.f32 %v155_v16  ;;  %v165_v23 = vand.u32 2147483647, %v155_v16 }
  0xa9   :  { %v168_v25 = vor.u32 1.1754944e-38, %v167_v22  ;;  %vm166_vm4 = vcmp.eq.f32.partialorder %v165_v23, 8.507059e+37 }
  0xad   :  { %v1716_v17 = vpop.eup %1715 }
  0xae   :  { %v157_v18 = vmul.f32 %v1716_v17, %v155_v16  ;;  %vm162_vm1 = vweird.f32 %v1716_v17 }
  0xaf   :  { %vm163_vm3 = vmor %vm161_vm2, %vm162_vm1 }
  0xb0   :  { %v158_v19 = vsub.f32 1.0, %v157_v18 }
  0xb2   :  { %v159_v20 = vmul.f32 %v1716_v17, %v158_v19 }
  0xb4   :  { %v160_v21 = vadd.f32 %v1716_v17, %v159_v20 }
  0xb6   :  { %v164_v24 = vsel %vm163_vm3, %v1716_v17, %v160_v21 }
  0xb7   :  { %v169_v27 = vsel %vm166_vm4, %v168_v25, %v164_v24 }
  0xb8   :  { %v172_v29 = vmul.f32 0.0, %v169_v27 }
 0x115   :  { %v175_v26 = vpop.permute.xlu0 %174 }
 0x116   :  { %v177_v28 = vmul.f32 %v175_v26, %v169_v27 }
 0x118   :  { %179 = vrot.lane.b32.xlu0 %v177_v28, %s1877_s5 }
 0x18a   :  { %v180_v30 = vpop.permute.xlu0 %179 }
 0x18b   :  { %v182_v31 = vadd.f32 %v180_v30, %v172_v29  ;;  %v1642_v30 = vld [vmem:[%s2529_s1 + $0x18] sm:$0xff] }
 0x18d   :  { %1717 = vtanh.f32 %v182_v31 }
 0x193   :  { %v1718_v32 = vpop.eup %1717 }
 0x194   :  { %185 = vrot.lane.b32.xlu1 %v1718_v32, %s1876_s18 }
 0x206   :  { %v186_v33 = vpop.permute.xlu1 %185 }
 0x207   :  { %v188_v34 = vmul.f32 %v186_v33, %v169_v27 }
 0x209   :  { %192 = vrot.lane.b32.xlu1 %v188_v34, %s1877_s5 }
 0x27b   :  { %v193_v36 = vpop.permute.xlu1 %192 }
 0x27c   :  { %1635 = vmatmul.msk.f32.vlgmr.msrb.gmra.mxu2 %vm103_vm5, %v193_v36 }
 0x27d   :  { %585 = vmatpush.msrb.mxu2 %v1960_v3 }
 0x27f   :  { %586 = vmatpush.msrb.mxu2 %v1962_v4 }
 0x284   :  { %1644 = vmatmul.msk.f32.vlgmr.msra.gmra.mxu2 %vm127_vm0, %v1642_v30 }
 0x285   :  { %761 = vmatpush.msra.mxu2 %v1960_v3 }
 0x287   :  { %762 = vmatpush.msra.mxu2 %v1962_v4 }
 0x2ff   :  { %v213_v38 = vpop.f32.mrf.mxu2 }
 0x300   :  { %v237_v39 = vadd.f32 %v236_v37, %v213_v38 }
 0x302   :  { %v239_v40 = vadd.f32 %v2007_v9, %v237_v39 }
 0x304   :  { %1719 = vtanh.f32 %v239_v40  ;;  %v1637_v42 = vmul.f32 -1.442695, %v239_v40 }
 0x306   :  { %1721 = vpow2.f32 %v1637_v42 }
 0x307   :  { %v412_v32 = vpop.f32.mrf.mxu2 }
 0x30a   :  { %v1720_v41 = vpop.eup %1719 }
 0x30b   :  { %262 = vrot.lane.b32.xlu2 %v1720_v41, %s1876_s18 }
 0x30c   :  { %v1722_v43 = vpop.eup %1721 }
 0x30d   :  { %v243_v44 = vadd.f32 1.0, %v1722_v43 }
 0x30f   :  { %1723 = vrcp.f32 %v243_v44  ;;  %v255_v50 = vand.u32 2147483648, %v243_v44  ;;  %vm249_vm7 = vweird.f32 %v243_v44  ;;  %v253_v51 = vand.u32 2147483647, %v243_v44 }
 0x311   :  { %v256_v53 = vor.u32 1.1754944e-38, %v255_v50  ;;  %vm254_vm9 = vcmp.eq.f32.partialorder %v253_v51, 8.507059e+37 }
 0x315   :  { %v1724_v45 = vpop.eup %1723 }
 0x316   :  { %v245_v46 = vmul.f32 %v1724_v45, %v243_v44  ;;  %vm250_vm6 = vweird.f32 %v1724_v45 }
 0x317   :  { %vm251_vm8 = vmor %vm249_vm7, %vm250_vm6 }
 0x318   :  { %v246_v47 = vsub.f32 1.0, %v245_v46 }
 0x31a   :  { %v247_v48 = vmul.f32 %v1724_v45, %v246_v47 }
 0x31c   :  { %v248_v49 = vadd.f32 %v1724_v45, %v247_v48 }
 0x31e   :  { %v252_v52 = vsel %vm251_vm8, %v1724_v45, %v248_v49 }
 0x31f   :  { %v257_v55 = vsel %vm254_vm9, %v256_v53, %v252_v52 }
 0x320   :  { %v260_v57 = vmul.f32 %v257_v55, %v182_v31 }
 0x365   :  { %v263_v54 = vpop.permute.xlu2 %262 }
 0x366   :  { %v265_v56 = vmul.f32 %v263_v54, %v257_v55  ;;  %v1646_v54 = vld [vmem:[%s2529_s1 + $0x20] sm:$0xff] }
 0x368   :  { %267 = vrot.lane.b32.xlu2 %v265_v56, %s1877_s5 }
 0x3c2   :  { %v268_v58 = vpop.permute.xlu2 %267 }
 0x3c3   :  { %v270_v59 = vadd.f32 %v268_v58, %v260_v57 }
 0x3c5   :  { %1725 = vtanh.f32 %v270_v59 }
 0x3cb   :  { %v1726_v60 = vpop.eup %1725 }
 0x3cc   :  { %273 = vrot.lane.b32.xlu0 %v1726_v60, %s1876_s18 }
 0x43e   :  { %v274_v62 = vpop.permute.xlu0 %273 }
 0x43f   :  { %v276_v63 = vmul.f32 %v274_v62, %v257_v55 }
 0x441   :  { %280 = vrot.lane.b32.xlu1 %v276_v63, %s1877_s5 }
 0x4b3   :  { %v281_v5 = vpop.permute.xlu1 %280 }
 0x4b4   :  { %1639 = vmatmul.msk.f32.vlgmr.msrb.gmra.mxu1 %vm103_vm5, %v281_v5 }
 0x4b5   :  { %648 = vmatpush.msrb.mxu1 %v1947_v0 }
 0x4b7   :  { %649 = vmatpush.msrb.mxu1 %v1952_v1 }
 0x4b9   :  { %650 = vmatpush.msrb.mxu1 %v1958_v2 }
 0x4bb   :  { %651 = vmatpush.msrb.mxu1 %v1975_v6 }
 0x531   :  { %v301_v8 = vpop.f32.mrf.mxu1 }
 0x532   :  { %v325_v10 = vadd.f32 %v324_v7, %v301_v8 }
 0x534   :  { %v327_v11 = vadd.f32 %v2007_v9, %v325_v10 }
 0x536   :  { %1727 = vtanh.f32 %v327_v11  ;;  %v1641_v13 = vmul.f32 -1.442695, %v327_v11 }
 0x538   :  { %1729 = vpow2.f32 %v1641_v13 }
 0x53c   :  { %v1728_v12 = vpop.eup %1727 }
 0x53d   :  { %350 = vrot.lane.b32.xlu2 %v1728_v12, %s1876_s18 }
 0x53e   :  { %v1730_v14 = vpop.eup %1729 }
 0x53f   :  { %v331_v15 = vadd.f32 1.0, %v1730_v14 }
 0x541   :  { %1731 = vrcp.f32 %v331_v15  ;;  %v343_v6 = vand.u32 2147483648, %v331_v15  ;;  %vm337_vm11 = vweird.f32 %v331_v15  ;;  %v341_v18 = vand.u32 2147483647, %v331_v15 }
 0x543   :  { %v344_v20 = vor.u32 1.1754944e-38, %v343_v6  ;;  %vm342_vm13 = vcmp.eq.f32.partialorder %v341_v18, 8.507059e+37 }
 0x547   :  { %v1732_v0 = vpop.eup %1731 }
 0x548   :  { %v333_v1 = vmul.f32 %v1732_v0, %v331_v15  ;;  %vm338_vm10 = vweird.f32 %v1732_v0 }
 0x549   :  { %vm339_vm12 = vmor %vm337_vm11, %vm338_vm10 }
 0x54a   :  { %v334_v16 = vsub.f32 1.0, %v333_v1 }
 0x54c   :  { %v335_v2 = vmul.f32 %v1732_v0, %v334_v16 }
 0x54e   :  { %v336_v17 = vadd.f32 %v1732_v0, %v335_v2 }
 0x550   :  { %v340_v19 = vsel %vm339_vm12, %v1732_v0, %v336_v17 }
 0x551   :  { %v345_v22 = vsel %vm342_vm13, %v344_v20, %v340_v19 }
 0x552   :  { %v348_v24 = vmul.f32 %v345_v22, %v270_v59 }
 0x597   :  { %v351_v21 = vpop.permute.xlu2 %350 }
 0x598   :  { %v353_v23 = vmul.f32 %v351_v21, %v345_v22  ;;  %v1650_v21 = vld [vmem:[%s2529_s1 + $0x28] sm:$0xff] }
 0x599   :  { %1652 = vmatmul.msk.f32.vlgmr.msrb.gmra.mxu2 %vm127_vm0, %v1650_v21 }
 0x59a   :  { %355 = vrot.lane.b32.xlu0 %v353_v23, %s1877_s5 }
 0x60c   :  { %v356_v25 = vpop.permute.xlu0 %355 }
 0x60d   :  { %v358_v26 = vadd.f32 %v356_v25, %v348_v24 }
 0x60f   :  { %1733 = vtanh.f32 %v358_v26 }
 0x615   :  { %v1734_v27 = vpop.eup %1733 }
 0x616   :  { %361 = vrot.lane.b32.xlu1 %v1734_v27, %s1876_s18 }
 0x61c   :  { %v588_v25 = vpop.f32.mrf.mxu2 }
 0x688   :  { %v362_v28 = vpop.permute.xlu1 %361 }
 0x689   :  { %v364_v29 = vmul.f32 %v362_v28, %v345_v22 }
 0x68b   :  { %368 = vrot.lane.b32.xlu2 %v364_v29, %s1877_s5 }
 0x6e5   :  { %v369_v31 = vpop.permute.xlu2 %368 }
 0x6e6   :  { %1643 = vmatmul.msk.f32.vlgmr.msra.gmra.mxu3 %vm103_vm5, %v369_v31 }
 0x6e7   :  { %673 = vmatpush.msra.mxu3 %v1960_v3 }
 0x6e9   :  { %674 = vmatpush.msra.mxu3 %v1962_v4 }
 0x6ee   :  { %1648 = vmatmul.msk.f32.vlgmr.msrb.gmra.mxu3 %vm127_vm0, %v1646_v54 }
 0x769   :  { %v389_v33 = vpop.f32.mrf.mxu3 }
 0x76a   :  { %v413_v34 = vadd.f32 %v412_v32, %v389_v33 }
 0x76c   :  { %v415_v35 = vadd.f32 %v2007_v9, %v413_v34 }
 0x76e   :  { %1735 = vtanh.f32 %v415_v35  ;;  %v1645_v37 = vmul.f32 -1.442695, %v415_v35 }
 0x770   :  { %1737 = vpow2.f32 %v1645_v37 }
 0x771   :  { %v500_v58 = vpop.f32.mrf.mxu3 }
 0x774   :  { %v1736_v36 = vpop.eup %1735 }
 0x775   :  { %438 = vrot.lane.b32.xlu0 %v1736_v36, %s1876_s18 }
 0x776   :  { %v1738_v38 = vpop.eup %1737 }
 0x777   :  { %v419_v39 = vadd.f32 1.0, %v1738_v38 }
 0x779   :  { %1739 = vrcp.f32 %v419_v39  ;;  %v431_v4 = vand.u32 2147483648, %v419_v39  ;;  %vm425_vm15 = vweird.f32 %v419_v39  ;;  %v429_v44 = vand.u32 2147483647, %v419_v39 }
 0x77b   :  { %v432_v46 = vor.u32 1.1754944e-38, %v431_v4  ;;  %vm430_vm2 = vcmp.eq.f32.partialorder %v429_v44, 8.507059e+37 }
 0x77f   :  { %v1740_v40 = vpop.eup %1739 }
 0x780   :  { %v421_v41 = vmul.f32 %v1740_v40, %v419_v39  ;;  %vm426_vm14 = vweird.f32 %v1740_v40 }
 0x781   :  { %vm427_vm1 = vmor %vm425_vm15, %vm426_vm14 }
 0x782   :  { %v422_v42 = vsub.f32 1.0, %v421_v41 }
 0x784   :  { %v423_v3 = vmul.f32 %v1740_v40, %v422_v42 }
 0x786   :  { %v424_v43 = vadd.f32 %v1740_v40, %v423_v3 }
 0x788   :  { %v428_v45 = vsel %vm427_vm1, %v1740_v40, %v424_v43 }
 0x789   :  { %v433_v48 = vsel %vm430_vm2, %v432_v46, %v428_v45 }
 0x78a   :  { %v436_v50 = vmul.f32 %v433_v48, %v358_v26 }
 0x7e7   :  { %v439_v47 = vpop.permute.xlu0 %438 }
 0x7e8   :  { %v441_v49 = vmul.f32 %v439_v47, %v433_v48  ;;  %v1654_v47 = vld [vmem:[%s2529_s1 + $0x30] sm:$0xff] }
 0x7e9   :  { %1656 = vmatmul.msk.f32.vlgmr.msra.gmra.mxu3 %vm127_vm0, %v1654_v47  ;;  %v2155_v47 = vld [vmem:[%s2534_s6 + $0x50] sm:$0xff] }
 0x7ea   :  { %443 = vrot.lane.b32.xlu1 %v441_v49, %s1877_s5 }
 0x85c   :  { %v444_v51 = vpop.permute.xlu1 %443 }
 0x85d   :  { %v446_v52 = vadd.f32 %v444_v51, %v436_v50 }
 0x85f   :  { %1741 = vtanh.f32 %v446_v52 }
 0x865   :  { %v1742_v53 = vpop.eup %1741 }
 0x866   :  { %449 = vrot.lane.b32.xlu2 %v1742_v53, %s1876_s18 }
 0x86c   :  { %v676_v51 = vpop.f32.mrf.mxu3 }
 0x8c0   :  { %v450_v55 = vpop.permute.xlu2 %449 }
 0x8c1   :  { %v452_v56 = vmul.f32 %v450_v55, %v433_v48 }
 0x8c3   :  { %456 = vrot.lane.b32.xlu0 %v452_v56, %s1877_s5 }
 0x935   :  { %v457_v57 = vpop.permute.xlu0 %456 }
 0x936   :  { %1647 = vmatmul.msk.f32.vlgmr.msra.gmra.mxu1 %vm103_vm5, %v457_v57 }
 0x9b3   :  { %v477_v59 = vpop.f32.mrf.mxu1 }
 0x9b4   :  { %v501_v60 = vadd.f32 %v500_v58, %v477_v59 }
 0x9b6   :  { %v503_v61 = vadd.f32 %v2007_v9, %v501_v60 }
 0x9b8   :  { %1743 = vtanh.f32 %v503_v61  ;;  %v1649_v63 = vmul.f32 -1.442695, %v503_v61 }
 0x9ba   :  { %1745 = vpow2.f32 %v1649_v63 }
 0x9be   :  { %v1744_v62 = vpop.eup %1743 }
 0x9bf   :  { %526 = vrot.lane.b32.xlu1 %v1744_v62, %s1876_s18 }
 0x9c0   :  { %v1746_v5 = vpop.eup %1745 }
 0x9c1   :  { %v507_v7 = vadd.f32 1.0, %v1746_v5 }
 0x9c3   :  { %1747 = vrcp.f32 %v507_v7  ;;  %v519_v14 = vand.u32 2147483648, %v507_v7  ;;  %vm513_vm4 = vweird.f32 %v507_v7  ;;  %v517_v15 = vand.u32 2147483647, %v507_v7 }
 0x9c5   :  { %v520_v1 = vor.u32 1.1754944e-38, %v519_v14  ;;  %vm518_vm7 = vcmp.eq.f32.partialorder %v517_v15, 8.507059e+37 }
 0x9c9   :  { %v1748_v8 = vpop.eup %1747 }
 0x9ca   :  { %v509_v10 = vmul.f32 %v1748_v8, %v507_v7  ;;  %vm514_vm3 = vweird.f32 %v1748_v8 }
 0x9cb   :  { %vm515_vm6 = vmor %vm513_vm4, %vm514_vm3 }
 0x9cc   :  { %v510_v11 = vsub.f32 1.0, %v509_v10 }
 0x9ce   :  { %v511_v12 = vmul.f32 %v1748_v8, %v510_v11 }
 0x9d0   :  { %v512_v13 = vadd.f32 %v1748_v8, %v511_v12 }
 0x9d2   :  { %v516_v0 = vsel %vm515_vm6, %v1748_v8, %v512_v13 }
 0x9d3   :  { %v521_v2 = vsel %vm518_vm7, %v520_v1, %v516_v0 }
 0x9d4   :  { %v524_v6 = vmul.f32 %v521_v2, %v446_v52 }
 0xa31   :  { %v527_v16 = vpop.permute.xlu1 %526 }
 0xa32   :  { %v529_v17 = vmul.f32 %v527_v16, %v521_v2  ;;  %v1658_v16 = vld [vmem:[%s2529_s1 + $0x38] sm:$0xff]  ;;  %s805_s1 = sld [smem:[#allocation3]] }
 0xa33   :  { %1660 = vmatmul.msk.f32.vlgmr.msra.gmra.mxu2 %vm127_vm0, %v1658_v16 }
 0xa34   :  { %531 = vrot.lane.b32.xlu2 %v529_v17, %s1877_s5 }
 0xa38   :  { %p806_p0 = scmp.ne.s32.totalorder %s805_s1, 0 }
 0xa39   :  { %s1512_s1 = scalar_select %p1511_p6, 1, 0 }
 0xa3a   :  { %s2160_s29 = scalar_select %p806_p0, 1, 0 }
 0xa8e   :  { %v532_v18 = vpop.permute.xlu2 %531 }
 0xa8f   :  { %v534_v19 = vadd.f32 %v532_v18, %v524_v6 }
 0xa91   :  { %1749 = vtanh.f32 %v534_v19 }
 0xa97   :  { %v1750_v20 = vpop.eup %1749 }
 0xa98   :  { %537 = vrot.lane.b32.xlu0 %v1750_v20, %s1876_s18 }
 0xab6   :  { %v764_v18 = vpop.f32.mrf.mxu2 }
 0xb0a   :  { %v538_v22 = vpop.permute.xlu0 %537 }
 0xb0b   :  { %v540_v23 = vmul.f32 %v538_v22, %v521_v2 }
 0xb0d   :  { %544 = vrot.lane.b32.xlu1 %v540_v23, %s1877_s5 }
 0xb7f   :  { %v545_v24 = vpop.permute.xlu1 %544 }
 0xb80   :  { %1651 = vmatmul.msk.f32.vlgmr.msra.gmra.mxu0 %vm103_vm5, %v545_v24 }
 0xbfd   :  { %v565_v26 = vpop.f32.mrf.mxu0 }
 0xbfe   :  { %v589_v27 = vadd.f32 %v588_v25, %v565_v26 }
 0xc00   :  { %v591_v28 = vadd.f32 %v2007_v9, %v589_v27 }
 0xc02   :  { %1751 = vtanh.f32 %v591_v28  ;;  %v1653_v30 = vmul.f32 -1.442695, %v591_v28 }
 0xc04   :  { %1753 = vpow2.f32 %v1653_v30 }
 0xc08   :  { %v1752_v29 = vpop.eup %1751 }
 0xc09   :  { %614 = vrot.lane.b32.xlu2 %v1752_v29, %s1876_s18 }
 0xc0a   :  { %v1754_v31 = vpop.eup %1753 }
 0xc0b   :  { %v595_v32 = vadd.f32 1.0, %v1754_v31 }
 0xc0d   :  { %1755 = vrcp.f32 %v595_v32  ;;  %v607_v38 = vand.u32 2147483648, %v595_v32  ;;  %vm601_vm9 = vweird.f32 %v595_v32  ;;  %v605_v39 = vand.u32 2147483647, %v595_v32 }
 0xc0f   :  { %v608_v41 = vor.u32 1.1754944e-38, %v607_v38  ;;  %vm606_vm11 = vcmp.eq.f32.partialorder %v605_v39, 8.507059e+37 }
 0xc13   :  { %v1756_v33 = vpop.eup %1755 }
 0xc14   :  { %v597_v34 = vmul.f32 %v1756_v33, %v595_v32  ;;  %vm602_vm8 = vweird.f32 %v1756_v33 }
 0xc15   :  { %vm603_vm10 = vmor %vm601_vm9, %vm602_vm8 }
 0xc16   :  { %v598_v35 = vsub.f32 1.0, %v597_v34 }
 0xc18   :  { %v599_v36 = vmul.f32 %v1756_v33, %v598_v35 }
 0xc1a   :  { %v600_v37 = vadd.f32 %v1756_v33, %v599_v36 }
 0xc1c   :  { %v604_v40 = vsel %vm603_vm10, %v1756_v33, %v600_v37 }
 0xc1d   :  { %v609_v3 = vsel %vm606_vm11, %v608_v41, %v604_v40  ;;  %v2109_v41 = vld [vmem:[%s2534_s6 + $0x78] sm:$0xff] }
 0xc1e   :  { %v612_v4 = vmul.f32 %v609_v3, %v534_v19  ;;  %841 = vmatpush.msrb.mxu3 %v2109_v41 }
 0xc63   :  { %v615_v42 = vpop.permute.xlu2 %614 }
 0xc64   :  { %v617_v43 = vmul.f32 %v615_v42, %v609_v3  ;;  %v2114_v42 = vld [vmem:[%s2534_s6 + $0x70] sm:$0xff] }
 0xc65   :  { %842 = vmatpush.msrb.mxu3 %v2114_v42 }
 0xc66   :  { %619 = vrot.lane.b32.xlu0 %v617_v43, %s1877_s5  ;;  %v2126_v43 = vld [vmem:[%s2534_s6 + $0x60] sm:$0xff] }
 0xcd8   :  { %v620_v44 = vpop.permute.xlu0 %619 }
 0xcd9   :  { %v622_v45 = vadd.f32 %v620_v44, %v612_v4  ;;  %v2132_v4 = vld [vmem:[%s2535_s7 + $0x18] sm:$0xff]  ;;  %v2137_v44 = vld [vmem:[%s2535_s7 + $0x10] sm:$0xff] }
 0xcda   :  { %833 = vmatpush.msra.mxu1 %v2132_v4  ;;  %949 = vmatpush.msrb.mxu2 %v2132_v4 }
 0xcdb   :  { %1757 = vtanh.f32 %v622_v45 }
 0xcdc   :  { %834 = vmatpush.msra.mxu1 %v2137_v44  ;;  %950 = vmatpush.msrb.mxu2 %v2137_v44 }
 0xce1   :  { %v1758_v46 = vpop.eup %1757 }
 0xce2   :  { %625 = vrot.lane.b32.xlu1 %v1758_v46, %s1876_s18  ;;  %v2150_v46 = vld [vmem:[%s2535_s7 + $0x8] sm:$0xff] }
 0xce3   :  { %835 = vmatpush.msra.mxu1 %v2150_v46  ;;  %951 = vmatpush.msrb.mxu2 %v2150_v46 }
 0xd54   :  { %v626_v48 = vpop.permute.xlu1 %625 }
 0xd55   :  { %v628_v49 = vmul.f32 %v626_v48, %v609_v3  ;;  %v2120_v3 = vld [vmem:[%s2534_s6 + $0x68] sm:$0xff]  ;;  %v2165_v48 = vld [vmem:[%s2535_s7] sm:$0xff]  ;;  %s808_s7 = scvt.s32.f32 %s2160_s29 }
 0xd56   :  { %843 = vmatpush.msrb.mxu3 %v2120_v3  ;;  %836 = vmatpush.msra.mxu1 %v2165_v48 }
 0xd57   :  { %632 = vrot.lane.b32.xlu2 %v628_v49, %s1877_s5  ;;  %v2170_v49 = vld [vmem:[%s2534_s6 + $0x48] sm:$0xff]  ;;  %952 = vmatpush.msrb.mxu2 %v2165_v48  ;;  %s812_s19 = ssub.f32 1.0, %s808_s7 }
 0xd58   :  { %844 = vmatpush.msrb.mxu3 %v2126_v43 }
 0xd59   :  { %1066 = vmatpush.msra.mxu2 %v2132_v4 }
 0xd5b   :  { %1067 = vmatpush.msra.mxu2 %v2137_v44 }
 0xd5d   :  { %1068 = vmatpush.msra.mxu2 %v2150_v46 }
 0xd5f   :  { %1069 = vmatpush.msra.mxu2 %v2165_v48 }
 0xdb1   :  { %v633_v50 = vpop.permute.xlu2 %632 }
 0xdb2   :  { %1655 = vmatmul.msk.f32.vlgmr.msrb.gmra.mxu1 %vm103_vm5, %v633_v50  ;;  %v2178_v50 = vld [vmem:[%s2534_s6 + $0x40] sm:$0xff] }
 0xdb3   :  { %957 = vmatpush.msrb.mxu1 %v2109_v41 }
 0xdb5   :  { %958 = vmatpush.msrb.mxu1 %v2114_v42 }
 0xdb7   :  { %959 = vmatpush.msrb.mxu1 %v2120_v3 }
 0xdb9   :  { %960 = vmatpush.msrb.mxu1 %v2126_v43 }
 0xe2f   :  { %v653_v52 = vpop.f32.mrf.mxu1 }
 0xe30   :  { %v677_v53 = vadd.f32 %v676_v51, %v653_v52  ;;  %v2188_v51 = vld [vmem:[%s2534_s6 + $0x38] sm:$0xff]  ;;  %v2196_v52 = vld [vmem:[%s2534_s6 + $0x30] sm:$0xff] }
 0xe32   :  { %v679_v54 = vadd.f32 %v2007_v9, %v677_v53  ;;  %v2204_v53 = vld [vmem:[%s2534_s6 + $0x28] sm:$0xff] }
 0xe34   :  { %1759 = vtanh.f32 %v679_v54  ;;  %v1657_v56 = vmul.f32 -1.442695, %v679_v54  ;;  %v2212_v54 = vld [vmem:[%s2534_s6 + $0x20] sm:$0xff] }
 0xe36   :  { %1761 = vpow2.f32 %v1657_v56  ;;  %v810_v56 = vstv %s808_s7 }
 0xe3a   :  { %v1760_v55 = vpop.eup %1759 }
 0xe3b   :  { %702 = vrot.lane.b32.xlu0 %v1760_v55, %s1876_s18  ;;  %v809_v55 = vld [vmem:[%s2530_s2] sm:$0xff] }
 0xe3c   :  { %v1762_v57 = vpop.eup %1761 }
 0xe3d   :  { %v683_v58 = vadd.f32 1.0, %v1762_v57  ;;  %v813_v57 = vstv %s812_s19 }
 0xe3f   :  { %1763 = vrcp.f32 %v683_v58  ;;  %v695_v5 = vand.u32 2147483648, %v683_v58  ;;  %vm689_vm13 = vweird.f32 %v683_v58  ;;  %v693_v7 = vand.u32 2147483647, %v683_v58 }
 0xe41   :  { %v696_v10 = vor.u32 1.1754944e-38, %v695_v5  ;;  %vm694_vm15 = vcmp.eq.f32.partialorder %v693_v7, 8.507059e+37 }
 0xe45   :  { %v1764_v59 = vpop.eup %1763 }
 0xe46   :  { %v685_v60 = vmul.f32 %v1764_v59, %v683_v58  ;;  %vm690_vm12 = vweird.f32 %v1764_v59  ;;  %v2223_v58 = vld [vmem:[%s2534_s6 + $0x18] sm:$0xff] }
 0xe47   :  { %vm691_vm14 = vmor %vm689_vm13, %vm690_vm12 }
 0xe48   :  { %v686_v61 = vsub.f32 1.0, %v685_v60  ;;  %v811_v60 = vmul.f32 %v810_v56, %v809_v55 }
 0xe4a   :  { %v687_v62 = vmul.f32 %v1764_v59, %v686_v61  ;;  %v814_v61 = vmul.f32 0.0, %v813_v57 }
 0xe4c   :  { %v688_v63 = vadd.f32 %v1764_v59, %v687_v62  ;;  %v2237_v62 = vld [vmem:[%s2534_s6 + $0x8] sm:$0xff]  ;;  %v815_v5 = vadd.f32 %v814_v61, %v811_v60 }
 0xe4e   :  { %v692_v8 = vsel %vm691_vm14, %v1764_v59, %v688_v63  ;;  %v2230_v59 = vld [vmem:[%s2534_s6 + $0x10] sm:$0xff]  ;;  %v2244_v63 = vld [vmem:[%s2534_s6] sm:$0xff] }
 0xe4f   :  { %v697_v12 = vsel %vm694_vm15, %v696_v10, %v692_v8 }
 0xe50   :  { %v700_v14 = vmul.f32 %v697_v12, %v622_v45  ;;  %v2142_v45 = vld [vmem:[%s2534_s6 + $0x58] sm:$0xff]  ;;  %s1513_s6 = scvt.s32.f32 %s1512_s1 }
 0xe51   :  { %845 = vmatpush.msrb.mxu3 %v2142_v45  ;;  %961 = vmatpush.msrb.mxu1 %v2142_v45 }
 0xe52   :  { %s1518_s12 = ssub.f32 1.0, %s1513_s6 }
 0xe53   :  { %846 = vmatpush.msrb.mxu3 %v2155_v47  ;;  %962 = vmatpush.msrb.mxu1 %v2155_v47 }
 0xe55   :  { %847 = vmatpush.msrb.mxu3 %v2170_v49  ;;  %963 = vmatpush.msrb.mxu1 %v2170_v49 }
 0xe57   :  { %848 = vmatpush.msrb.mxu3 %v2178_v50  ;;  %964 = vmatpush.msrb.mxu1 %v2178_v50 }
 0xe59   :  { %849 = vmatpush.msrb.mxu3 %v2188_v51  ;;  %965 = vmatpush.msrb.mxu1 %v2188_v51 }
 0xe5b   :  { %850 = vmatpush.msrb.mxu3 %v2196_v52  ;;  %966 = vmatpush.msrb.mxu1 %v2196_v52 }
 0xe5d   :  { %851 = vmatpush.msrb.mxu3 %v2204_v53  ;;  %967 = vmatpush.msrb.mxu1 %v2204_v53 }
 0xe5f   :  { %852 = vmatpush.msrb.mxu3 %v2212_v54  ;;  %968 = vmatpush.msrb.mxu1 %v2212_v54 }
 0xe61   :  { %853 = vmatpush.msrb.mxu3 %v2223_v58  ;;  %969 = vmatpush.msrb.mxu1 %v2223_v58 }
 0xe63   :  { %854 = vmatpush.msrb.mxu3 %v2230_v59  ;;  %970 = vmatpush.msrb.mxu1 %v2230_v59 }
 0xe65   :  { %855 = vmatpush.msrb.mxu3 %v2237_v62  ;;  %971 = vmatpush.msrb.mxu1 %v2237_v62 }
 0xe67   :  { %856 = vmatpush.msrb.mxu3 %v2244_v63  ;;  %972 = vmatpush.msrb.mxu1 %v2244_v63 }
 0xe68   :  { %857 = vmatmul.f32.vlgmr.msrb.gmra.mxu3 %v815_v5 }
 0xe69   :  { %1191 = vmatpush.msra.mxu3 %v2109_v41 }
 0xe6b   :  { %1192 = vmatpush.msra.mxu3 %v2114_v42 }
 0xe6d   :  { %1193 = vmatpush.msra.mxu3 %v2120_v3 }
 0xe6f   :  { %1194 = vmatpush.msra.mxu3 %v2126_v43 }
 0xe71   :  { %1195 = vmatpush.msra.mxu3 %v2142_v45 }
 0xe73   :  { %1196 = vmatpush.msra.mxu3 %v2155_v47 }
 0xe75   :  { %1197 = vmatpush.msra.mxu3 %v2170_v49 }
 0xe77   :  { %1198 = vmatpush.msra.mxu3 %v2178_v50 }
 0xe79   :  { %1199 = vmatpush.msra.mxu3 %v2188_v51 }
 0xe7b   :  { %1200 = vmatpush.msra.mxu3 %v2196_v52 }
 0xe7d   :  { %1201 = vmatpush.msra.mxu3 %v2204_v53 }
 0xe7f   :  { %1202 = vmatpush.msra.mxu3 %v2212_v54 }
 0xe81   :  { %1203 = vmatpush.msra.mxu3 %v2223_v58 }
 0xe83   :  { %1204 = vmatpush.msra.mxu3 %v2230_v59 }
 0xe85   :  { %1205 = vmatpush.msra.mxu3 %v2237_v62 }
 0xe87   :  { %1206 = vmatpush.msra.mxu3 %v2244_v63 }
 0xe89   :  { %1534 = vmatpush.msrb.mxu3 %v2132_v4 }
 0xe8b   :  { %1535 = vmatpush.msrb.mxu3 %v2137_v44 }
 0xe8d   :  { %1536 = vmatpush.msrb.mxu3 %v2150_v46 }
 0xe8f   :  { %1537 = vmatpush.msrb.mxu3 %v2165_v48 }
 0xead   :  { %v703_v11 = vpop.permute.xlu0 %702 }
 0xeae   :  { %v705_v13 = vmul.f32 %v703_v11, %v697_v12 }
 0xeb0   :  { %707 = vrot.lane.b32.xlu1 %v705_v13, %s1877_s5 }
 0xeeb   :  { %v858_v11 = vpop.f32.mrf.mxu3 }
 0xf22   :  { %v708_v15 = vpop.permute.xlu1 %707 }
 0xf23   :  { %v710_v0 = vadd.f32 %v708_v15, %v700_v14 }
 0xf25   :  { %1765 = vtanh.f32 %v710_v0 }
 0xf2b   :  { %v1766_v1 = vpop.eup %1765 }
 0xf2c   :  { %713 = vrot.lane.b32.xlu2 %v1766_v1, %s1876_s18 }
 0xf86   :  { %v714_v2 = vpop.permute.xlu2 %713 }
 0xf87   :  { %v716_v17 = vmul.f32 %v714_v2, %v697_v12  ;;  %v2286_v12 = vld [vmem:[%s2536_s8] ss:$0 sm:$0xff]  ;;  %s1161_s8 = scalar_select %p1160_p3, 1, 0 }
 0xf89   :  { %720 = vrot.lane.b32.xlu0 %v716_v17, %s1877_s5  ;;  %s1162_s13 = scvt.s32.f32 %s1161_s8 }
 0xf8b   :  { %s1167_s14 = ssub.f32 1.0, %s1162_s13 }
 0xffb   :  { %v721_v6 = vpop.permute.xlu0 %720 }
 0xffc   :  { %1659 = vmatmul.msk.f32.vlgmr.msrb.gmra.mxu0 %vm103_vm5, %v721_v6 }
0x1079   :  { %v741_v19 = vpop.f32.mrf.mxu0 }
0x107a   :  { %v765_v20 = vadd.f32 %v764_v18, %v741_v19 }
0x107c   :  { %v767_v21 = vadd.f32 %v2007_v9, %v765_v20 }
0x107e   :  { %1767 = vtanh.f32 %v767_v21  ;;  %v1661_v23 = vmul.f32 -1.442695, %v767_v21 }
0x1080   :  { %1769 = vpow2.f32 %v1661_v23 }
0x1084   :  { %v1768_v22 = vpop.eup %1767 }
0x1085   :  { %790 = vrot.lane.b32.xlu1 %v1768_v22, %s1876_s18 }
0x1086   :  { %v1770_v24 = vpop.eup %1769 }
0x1087   :  { %v771_v25 = vadd.f32 1.0, %v1770_v24 }
0x1089   :  { %1771 = vrcp.f32 %v771_v25  ;;  %v783_v31 = vand.u32 2147483648, %v771_v25  ;;  %vm777_vm1 = vweird.f32 %v771_v25  ;;  %v781_v32 = vand.u32 2147483647, %v771_v25 }
0x108b   :  { %v784_v33 = vor.u32 1.1754944e-38, %v783_v31  ;;  %vm782_vm3 = vcmp.eq.f32.partialorder %v781_v32, 8.507059e+37  ;;  %v2299_v32 = vld [vmem:[%s2537_s9 + $0x18] sm:$0xff] }
0x108c   :  { %916 = vmatpush.msra.mxu0 %v2299_v32 }
0x108f   :  { %v1772_v26 = vpop.eup %1771 }
0x1090   :  { %v773_v27 = vmul.f32 %v1772_v26, %v771_v25  ;;  %vm778_vm0 = vweird.f32 %v1772_v26 }
0x1091   :  { %vm779_vm2 = vmor %vm777_vm1, %vm778_vm0 }
0x1092   :  { %v774_v28 = vsub.f32 1.0, %v773_v27 }
0x1094   :  { %v775_v29 = vmul.f32 %v1772_v26, %v774_v28 }
0x1096   :  { %v776_v30 = vadd.f32 %v1772_v26, %v775_v29 }
0x1098   :  { %v780_v9 = vsel %vm779_vm2, %v1772_v26, %v776_v30 }
0x1099   :  { %v2097_v35 = vsel %vm782_vm3, %v784_v33, %v780_v9  ;;  %v2304_v9 = vld [vmem:[%s2537_s9 + $0x10] sm:$0xff]  ;;  %v2310_v33 = vld [vmem:[%s2537_s9 + $0x8] sm:$0xff] }
0x109a   :  { %v788_v37 = vmul.f32 %v2097_v35, %v710_v0  ;;  %917 = vmatpush.msra.mxu0 %v2304_v9 }
0x109c   :  { %918 = vmatpush.msra.mxu0 %v2310_v33 }
0x10f7   :  { %v791_v34 = vpop.permute.xlu1 %790 }
0x10f8   :  { %v793_v36 = vmul.f32 %v791_v34, %v2097_v35  ;;  %v2316_v34 = vld [vmem:[%s2537_s9] sm:$0xff]  ;;  %s1665_s9 = sld [smem:[#allocation3 + $0x1]] }
0x10f9   :  { %919 = vmatpush.msra.mxu0 %v2316_v34 }
0x10fa   :  { %795 = vrot.lane.b32.xlu2 %v793_v36, %s1877_s5 }
0x10fb   :  { %1032 = vmatpush.msrb.mxu0 %v2299_v32 }
0x10fd   :  { %1033 = vmatpush.msrb.mxu0 %v2304_v9 }
0x10fe   :  { %p926_p1 = scmp.ne.s32.totalorder %s1665_s9, 0 }
0x10ff   :  { %1034 = vmatpush.msrb.mxu0 %v2310_v33  ;;  %s1278_s9 = scalar_select %p1277_p4, 1, 0 }
0x1100   :  { %s927_s19 = scalar_select %p926_p1, 1, 0 }
0x1101   :  { %1035 = vmatpush.msrb.mxu0 %v2316_v34 }
0x1102   :  { %s928_s20 = scvt.s32.f32 %s927_s19  ;;  %s1279_s19 = scvt.s32.f32 %s1278_s9 }
0x1104   :  { %s933_s21 = ssub.f32 1.0, %s928_s20 }
0x1106   :  { %v934_v56 = vstv %s933_s21 }
0x1154   :  { %v796_v38 = vpop.permute.xlu2 %795 }
0x1155   :  { %v2102_v39 = vadd.f32 %v796_v38, %v788_v37  ;;  %v2350_v38 = vld [vmem:[%s2538_s10] ss:$0 sm:$0xff]  ;;  %s1671_s10 = sld [smem:[#allocation3 + $0x2]] }
0x1157   :  { %1773 = vtanh.f32 %v2102_v39 }
0x115b   :  { %p1043_p2 = scmp.ne.s32.totalorder %s1671_s10, 0  ;;  %s1401_s10 = ssub.f32 1.0, %s1396_s27 }
0x115d   :  { %v1774_v40 = vpop.eup %1773  ;;  %s1044_s0 = scalar_select %p1043_p2, 1, 0 }
0x115e   :  { %801 = vrot.lane.b32.xlu0 %v1774_v40, %s1876_s18  ;;  %v931_v40 = vstv %s928_s20  ;;  %s1284_s20 = ssub.f32 1.0, %s1279_s19 }
0x115f   :  { %s1045_s28 = scvt.s32.f32 %s1044_s0 }
0x1161   :  { %s1050_s29 = ssub.f32 1.0, %s1045_s28 }
0x11d0   :  { %v802_v7 = vpop.permute.xlu0 %801 }
0x11d1   :  { %v804_v8 = vmul.f32 %v802_v7, %v2097_v35 }
0x11d3   :  { %817 = vrot.lane.b32.xlu1 %v804_v8, %s1877_s5 }
0x1245   :  { %v818_v10 = vpop.permute.xlu1 %817 }
0x1246   :  { %1662 = vmatmul.msk.f32.vlgmr.msra.gmra.mxu1 %vm103_vm5, %v818_v10 }
0x1247   :  { %1300 = vmatpush.msra.mxu1 %v2132_v4 }
0x1249   :  { %1301 = vmatpush.msra.mxu1 %v2137_v44 }
0x124b   :  { %1302 = vmatpush.msra.mxu1 %v2150_v46 }
0x124d   :  { %1303 = vmatpush.msra.mxu1 %v2165_v48 }
0x12c3   :  { %v838_v13 = vpop.f32.mrf.mxu1 }
0x12c4   :  { %v859_v14 = vadd.f32 %v858_v11, %v838_v13 }
0x12c6   :  { %v861_v15 = vadd.f32 %v2286_v12, %v859_v14 }
0x12c8   :  { %1775 = vtanh.f32 %v861_v15  ;;  %v1663_v1 = vmul.f32 -1.442695, %v861_v15 }
0x12ca   :  { %1777 = vpow2.f32 %v1663_v1 }
0x12ce   :  { %v1776_v0 = vpop.eup %1775 }
0x12cf   :  { %884 = vrot.lane.b32.xlu2 %v1776_v0, %s1876_s18 }
0x12d0   :  { %v1778_v16 = vpop.eup %1777 }
0x12d1   :  { %v865_v2 = vadd.f32 1.0, %v1778_v16 }
0x12d3   :  { %1779 = vrcp.f32 %v865_v2  ;;  %v877_v21 = vand.u32 2147483648, %v865_v2  ;;  %vm871_vm6 = vweird.f32 %v865_v2  ;;  %v875_v22 = vand.u32 2147483647, %v865_v2 }
0x12d5   :  { %v878_v24 = vor.u32 1.1754944e-38, %v877_v21  ;;  %vm876_vm8 = vcmp.eq.f32.partialorder %v875_v22, 8.507059e+37 }
0x12d9   :  { %v1780_v17 = vpop.eup %1779 }
0x12da   :  { %v867_v6 = vmul.f32 %v1780_v17, %v865_v2  ;;  %vm872_vm4 = vweird.f32 %v1780_v17 }
0x12db   :  { %vm873_vm7 = vmor %vm871_vm6, %vm872_vm4 }
0x12dc   :  { %v868_v18 = vsub.f32 1.0, %v867_v6 }
0x12de   :  { %v869_v19 = vmul.f32 %v1780_v17, %v868_v18 }
0x12e0   :  { %v870_v20 = vadd.f32 %v1780_v17, %v869_v19 }
0x12e2   :  { %v874_v23 = vsel %vm873_vm7, %v1780_v17, %v870_v20 }
0x12e3   :  { %v879_v26 = vsel %vm876_vm8, %v878_v24, %v874_v23 }
0x12e4   :  { %v882_v28 = vmul.f32 %v879_v26, %v2102_v39  ;;  %v1666_v39 = vld [vmem:[%s2530_s2 + $0x8] sm:$0xff] }
0x12e5   :  { %v932_v60 = vmul.f32 %v1666_v39, %v931_v40 }
0x1329   :  { %v885_v25 = vpop.permute.xlu2 %884 }
0x132a   :  { %v887_v27 = vmul.f32 %v885_v25, %v879_v26 }
0x132c   :  { %889 = vrot.lane.b32.xlu0 %v887_v27, %s1877_s5 }
0x139e   :  { %v890_v29 = vpop.permute.xlu0 %889 }
0x139f   :  { %v2292_v30 = vadd.f32 %v890_v29, %v882_v28 }
0x13a1   :  { %1781 = vtanh.f32 %v2292_v30 }
0x13a7   :  { %v1782_v31 = vpop.eup %1781 }
0x13a8   :  { %895 = vrot.lane.b32.xlu1 %v1782_v31, %s1876_s18 }
0x141a   :  { %v896_v35 = vpop.permute.xlu1 %895 }
0x141b   :  { %v898_v36 = vmul.f32 %v896_v35, %v879_v26 }
0x141d   :  { %900 = vrot.lane.b32.xlu2 %v898_v36, %s1877_s5 }
0x1477   :  { %v901_v37 = vpop.permute.xlu2 %900 }
0x1478   :  { %1664 = vmatmul.msk.f32.vlgmr.msra.gmra.mxu0 %vm103_vm5, %v901_v37  ;;  %1667 = vmatmul.msk.f32.vlgmr.msrb.gmra.mxu2 %vm103_vm5, %v901_v37 }
0x1479   :  { %1074 = vmatpush.msra.mxu0 %v2109_v41  ;;  %1149 = vmatpush.msrb.mxu2 %v2299_v32 }
0x147b   :  { %1075 = vmatpush.msra.mxu0 %v2114_v42  ;;  %1150 = vmatpush.msrb.mxu2 %v2304_v9 }
0x147d   :  { %1076 = vmatpush.msra.mxu0 %v2120_v3  ;;  %1151 = vmatpush.msrb.mxu2 %v2310_v33 }
0x147f   :  { %1077 = vmatpush.msra.mxu0 %v2126_v43  ;;  %1152 = vmatpush.msrb.mxu2 %v2316_v34 }
0x1481   :  { %1078 = vmatpush.msra.mxu0 %v2142_v45 }
0x1483   :  { %1079 = vmatpush.msra.mxu0 %v2155_v47 }
0x1485   :  { %1080 = vmatpush.msra.mxu0 %v2170_v49 }
0x1487   :  { %1081 = vmatpush.msra.mxu0 %v2178_v50 }
0x1489   :  { %1082 = vmatpush.msra.mxu0 %v2188_v51 }
0x148b   :  { %1083 = vmatpush.msra.mxu0 %v2196_v52 }
0x148d   :  { %1084 = vmatpush.msra.mxu0 %v2204_v53 }
0x148f   :  { %1085 = vmatpush.msra.mxu0 %v2212_v54 }
0x1491   :  { %1086 = vmatpush.msra.mxu0 %v2223_v58 }
0x1493   :  { %1087 = vmatpush.msra.mxu0 %v2230_v59 }
0x1495   :  { %1088 = vmatpush.msra.mxu0 %v2237_v62 }
0x1497   :  { %1089 = vmatpush.msra.mxu0 %v2244_v63 }
0x14f5   :  { %v921_v55 = vpop.f32.mrf.mxu0 }
0x14f6   :  { %v922_v57 = vadd.f32 %v2350_v38, %v921_v55 }
0x14f8   :  { %924 = vst [vmem:[%s2539_s11] sm:$0xff] %v922_v57  ;;  %v935_v61 = vmul.f32 %v934_v56, %v922_v57 }
0x14fa   :  { %v936_v5 = vadd.f32 %v935_v61, %v932_v60 }
0x14fb   :  { %v954_v7 = vpop.f32.mrf.mxu2 }
0x14fc   :  { %973 = vmatmul.f32.vlgmr.msrb.gmra.mxu1 %v936_v5 }
0x14fd   :  { %1383 = vmatpush.msrb.mxu1 %v2299_v32 }
0x14ff   :  { %1384 = vmatpush.msrb.mxu1 %v2304_v9 }
0x1501   :  { %1385 = vmatpush.msrb.mxu1 %v2310_v33 }
0x1503   :  { %1386 = vmatpush.msrb.mxu1 %v2316_v34 }
0x1579   :  { %v974_v8 = vpop.f32.mrf.mxu1 }
0x157a   :  { %v975_v10 = vadd.f32 %v974_v8, %v954_v7 }
0x157c   :  { %v977_v11 = vadd.f32 %v2286_v12, %v975_v10 }
0x157e   :  { %1783 = vtanh.f32 %v977_v11  ;;  %v1668_v14 = vmul.f32 -1.442695, %v977_v11 }
0x1580   :  { %1785 = vpow2.f32 %v1668_v14 }
0x1584   :  { %v1784_v13 = vpop.eup %1783 }
0x1585   :  { %1000 = vrot.lane.b32.xlu0 %v1784_v13, %s1876_s18 }
0x1586   :  { %v1786_v15 = vpop.eup %1785 }
0x1587   :  { %v981_v0 = vadd.f32 1.0, %v1786_v15 }
0x1589   :  { %1787 = vrcp.f32 %v981_v0  ;;  %v993_v18 = vand.u32 2147483648, %v981_v0  ;;  %vm987_vm10 = vweird.f32 %v981_v0  ;;  %v991_v19 = vand.u32 2147483647, %v981_v0 }
0x158b   :  { %v994_v21 = vor.u32 1.1754944e-38, %v993_v18  ;;  %vm992_vm12 = vcmp.eq.f32.partialorder %v991_v19, 8.507059e+37 }
0x158f   :  { %v1788_v1 = vpop.eup %1787 }
0x1590   :  { %v983_v16 = vmul.f32 %v1788_v1, %v981_v0  ;;  %vm988_vm9 = vweird.f32 %v1788_v1 }
0x1591   :  { %vm989_vm11 = vmor %vm987_vm10, %vm988_vm9 }
0x1592   :  { %v984_v2 = vsub.f32 1.0, %v983_v16 }
0x1594   :  { %v985_v17 = vmul.f32 %v1788_v1, %v984_v2 }
0x1596   :  { %v986_v6 = vadd.f32 %v1788_v1, %v985_v17 }
0x1598   :  { %v990_v20 = vsel %vm989_vm11, %v1788_v1, %v986_v6 }
0x1599   :  { %v995_v23 = vsel %vm992_vm12, %v994_v21, %v990_v20 }
0x159a   :  { %v998_v25 = vmul.f32 %v995_v23, %v2292_v30  ;;  %v1048_v30 = vstv %s1045_s28 }
0x15f7   :  { %v1001_v22 = vpop.permute.xlu0 %1000 }
0x15f8   :  { %v1003_v24 = vmul.f32 %v1001_v22, %v995_v23 }
0x15fa   :  { %1005 = vrot.lane.b32.xlu1 %v1003_v24, %s1877_s5 }
0x166c   :  { %v1006_v26 = vpop.permute.xlu1 %1005 }
0x166d   :  { %v2367_v27 = vadd.f32 %v1006_v26, %v998_v25  ;;  %v1678_v25 = vld [vmem:[%s2530_s2 + $0x18] sm:$0xff]  ;;  %v1165_v26 = vstv %s1162_s13 }
0x166f   :  { %1789 = vtanh.f32 %v2367_v27 }
0x1675   :  { %v1790_v28 = vpop.eup %1789 }
0x1676   :  { %1011 = vrot.lane.b32.xlu2 %v1790_v28, %s1876_s18  ;;  %v1168_v28 = vstv %s1167_s14 }
0x16d0   :  { %v1012_v29 = vpop.permute.xlu2 %1011 }
0x16d1   :  { %v1014_v31 = vmul.f32 %v1012_v29, %v995_v23 }
0x16d3   :  { %1016 = vrot.lane.b32.xlu0 %v1014_v31, %s1877_s5  ;;  %v1166_v31 = vmul.f32 %v1678_v25, %v1165_v26 }
0x1745   :  { %v1017_v35 = vpop.permute.xlu0 %1016 }
0x1746   :  { %1669 = vmatmul.msk.f32.vlgmr.msrb.gmra.mxu0 %vm103_vm5, %v1017_v35  ;;  %1673 = vmatmul.msk.f32.vlgmr.msra.gmra.mxu2 %vm103_vm5, %v1017_v35 }
0x1747   :  { %1183 = vmatpush.msra.mxu2 %v2132_v4  ;;  %1417 = vmatpush.msrb.mxu0 %v2132_v4  ;;  %v1672_v4 = vld [vmem:[%s2530_s2 + $0x10] sm:$0xff] }
0x1748   :  { %v1049_v39 = vmul.f32 %v1672_v4, %v1048_v30 }
0x1749   :  { %1184 = vmatpush.msra.mxu2 %v2137_v44  ;;  %1418 = vmatpush.msrb.mxu0 %v2137_v44  ;;  %v1051_v44 = vstv %s1050_s29 }
0x174b   :  { %1185 = vmatpush.msra.mxu2 %v2150_v46  ;;  %1419 = vmatpush.msrb.mxu0 %v2150_v46 }
0x174d   :  { %1186 = vmatpush.msra.mxu2 %v2165_v48  ;;  %1420 = vmatpush.msrb.mxu0 %v2165_v48 }
0x17c3   :  { %v1037_v36 = vpop.f32.mrf.mxu0 }
0x17c4   :  { %v1038_v37 = vadd.f32 %v2350_v38, %v1037_v36 }
0x17c6   :  { %1670 = vst [vmem:[%s2539_s11 + $0x8] sm:$0xff] %v1038_v37  ;;  %v1052_v46 = vmul.f32 %v1051_v44, %v1038_v37 }
0x17c8   :  { %v1053_v48 = vadd.f32 %v1052_v46, %v1049_v39 }
0x17c9   :  { %v1071_v40 = vpop.f32.mrf.mxu2 }
0x17ca   :  { %1090 = vmatmul.f32.vlgmr.msra.gmra.mxu0 %v1053_v48 }
0x17cb   :  { %1500 = vmatpush.msra.mxu0 %v2299_v32 }
0x17cd   :  { %1501 = vmatpush.msra.mxu0 %v2304_v9 }
0x17cf   :  { %1502 = vmatpush.msra.mxu0 %v2310_v33 }
0x17d1   :  { %1503 = vmatpush.msra.mxu0 %v2316_v34 }
0x1847   :  { %v1091_v55 = vpop.f32.mrf.mxu0 }
0x1848   :  { %v1092_v56 = vadd.f32 %v1091_v55, %v1071_v40 }
0x184a   :  { %v1094_v57 = vadd.f32 %v2286_v12, %v1092_v56 }
0x184c   :  { %1791 = vtanh.f32 %v1094_v57  ;;  %v1674_v61 = vmul.f32 -1.442695, %v1094_v57 }
0x184e   :  { %1793 = vpow2.f32 %v1674_v61 }
0x1852   :  { %v1792_v60 = vpop.eup %1791 }
0x1853   :  { %1117 = vrot.lane.b32.xlu1 %v1792_v60, %s1876_s18 }
0x1854   :  { %v1794_v5 = vpop.eup %1793 }
0x1855   :  { %v1098_v7 = vadd.f32 1.0, %v1794_v5 }
0x1857   :  { %1795 = vrcp.f32 %v1098_v7  ;;  %v1110_v15 = vand.u32 2147483648, %v1098_v7  ;;  %vm1104_vm14 = vweird.f32 %v1098_v7  ;;  %v1108_v0 = vand.u32 2147483647, %v1098_v7 }
0x1859   :  { %v1111_v16 = vor.u32 1.1754944e-38, %v1110_v15  ;;  %vm1109_vm0 = vcmp.eq.f32.partialorder %v1108_v0, 8.507059e+37 }
0x185d   :  { %v1796_v8 = vpop.eup %1795 }
0x185e   :  { %v1100_v10 = vmul.f32 %v1796_v8, %v1098_v7  ;;  %vm1105_vm13 = vweird.f32 %v1796_v8 }
0x185f   :  { %vm1106_vm15 = vmor %vm1104_vm14, %vm1105_vm13 }
0x1860   :  { %v1101_v11 = vsub.f32 1.0, %v1100_v10 }
0x1862   :  { %v1102_v13 = vmul.f32 %v1796_v8, %v1101_v11 }
0x1864   :  { %v1103_v14 = vadd.f32 %v1796_v8, %v1102_v13 }
0x1866   :  { %v1107_v1 = vsel %vm1106_vm15, %v1796_v8, %v1103_v14 }
0x1867   :  { %v1112_v17 = vsel %vm1109_vm0, %v1111_v16, %v1107_v1  ;;  %v1684_v16 = vld [vmem:[%s2530_s2 + $0x20] sm:$0xff] }
0x1868   :  { %v1115_v18 = vmul.f32 %v1112_v17, %v2367_v27 }
0x18c5   :  { %v1118_v2 = vpop.permute.xlu1 %1117 }
0x18c6   :  { %v1120_v6 = vmul.f32 %v1118_v2, %v1112_v17  ;;  %v1282_v2 = vstv %s1279_s19 }
0x18c8   :  { %1122 = vrot.lane.b32.xlu2 %v1120_v6, %s1877_s5  ;;  %v1285_v6 = vstv %s1284_s20 }
0x1922   :  { %v1123_v19 = vpop.permute.xlu2 %1122 }
0x1923   :  { %v2397_v20 = vadd.f32 %v1123_v19, %v1115_v18  ;;  %v1283_v19 = vmul.f32 %v1684_v16, %v1282_v2 }
0x1925   :  { %1797 = vtanh.f32 %v2397_v20 }
0x192b   :  { %v1798_v21 = vpop.eup %1797 }
0x192c   :  { %1128 = vrot.lane.b32.xlu0 %v1798_v21, %s1876_s18 }
0x199e   :  { %v1129_v22 = vpop.permute.xlu0 %1128 }
0x199f   :  { %v1131_v23 = vmul.f32 %v1129_v22, %v1112_v17 }
0x19a1   :  { %1133 = vrot.lane.b32.xlu1 %v1131_v23, %s1877_s5 }
0x1a13   :  { %v1134_v24 = vpop.permute.xlu1 %1133 }
0x1a14   :  { %1675 = vmatmul.msk.f32.vlgmr.msrb.gmra.mxu2 %vm103_vm5, %v1134_v24 }
0x1a15   :  { %1266 = vmatpush.msrb.mxu2 %v2299_v32 }
0x1a17   :  { %1267 = vmatpush.msrb.mxu2 %v2304_v9 }
0x1a19   :  { %1268 = vmatpush.msrb.mxu2 %v2310_v33 }
0x1a1b   :  { %1269 = vmatpush.msrb.mxu2 %v2316_v34 }
0x1a1c   :  { %1679 = vmatmul.msk.f32.vlgmr.msra.gmra.mxu2 %vm103_vm5, %v1134_v24 }
0x1a1d   :  { %1308 = vmatpush.msra.mxu2 %v2109_v41 }
0x1a1f   :  { %1309 = vmatpush.msra.mxu2 %v2114_v42 }
0x1a21   :  { %1310 = vmatpush.msra.mxu2 %v2120_v3 }
0x1a23   :  { %1311 = vmatpush.msra.mxu2 %v2126_v43 }
0x1a25   :  { %1312 = vmatpush.msra.mxu2 %v2142_v45 }
0x1a27   :  { %1313 = vmatpush.msra.mxu2 %v2155_v47 }
0x1a29   :  { %1314 = vmatpush.msra.mxu2 %v2170_v49 }
0x1a2b   :  { %1315 = vmatpush.msra.mxu2 %v2178_v50 }
0x1a2d   :  { %1316 = vmatpush.msra.mxu2 %v2188_v51 }
0x1a2f   :  { %1317 = vmatpush.msra.mxu2 %v2196_v52 }
0x1a31   :  { %1318 = vmatpush.msra.mxu2 %v2204_v53 }
0x1a33   :  { %1319 = vmatpush.msra.mxu2 %v2212_v54 }
0x1a35   :  { %1320 = vmatpush.msra.mxu2 %v2223_v58 }
0x1a37   :  { %1321 = vmatpush.msra.mxu2 %v2230_v59 }
0x1a39   :  { %1322 = vmatpush.msra.mxu2 %v2237_v62 }
0x1a3b   :  { %1323 = vmatpush.msra.mxu2 %v2244_v63 }
0x1a97   :  { %v1154_v27 = vpop.f32.mrf.mxu2 }
0x1a98   :  { %v1155_v29 = vadd.f32 %v2350_v38, %v1154_v27 }
0x1a9a   :  { %1676 = vst [vmem:[%s2539_s11 + $0x10] sm:$0xff] %v1155_v29  ;;  %v1169_v35 = vmul.f32 %v1168_v28, %v1155_v29 }
0x1a9c   :  { %v1170_v4 = vadd.f32 %v1169_v35, %v1166_v31 }
0x1a9e   :  { %1207 = vmatmul.f32.vlgmr.msra.gmra.mxu3 %v1170_v4 }
0x1a9f   :  { %1617 = vmatpush.msra.mxu3 %v2299_v32  ;;  %v1188_v30 = vpop.f32.mrf.mxu2 }
0x1aa1   :  { %1618 = vmatpush.msra.mxu3 %v2304_v9 }
0x1aa3   :  { %1619 = vmatpush.msra.mxu3 %v2310_v33 }
0x1aa5   :  { %1620 = vmatpush.msra.mxu3 %v2316_v34 }
0x1b21   :  { %v1208_v36 = vpop.f32.mrf.mxu3 }
0x1b22   :  { %v1209_v44 = vadd.f32 %v1208_v36, %v1188_v30 }
0x1b24   :  { %v1211_v37 = vadd.f32 %v2286_v12, %v1209_v44 }
0x1b26   :  { %1799 = vtanh.f32 %v1211_v37  ;;  %v1680_v46 = vmul.f32 -1.442695, %v1211_v37 }
0x1b28   :  { %1801 = vpow2.f32 %v1680_v46 }
0x1b2c   :  { %v1800_v39 = vpop.eup %1799 }
0x1b2d   :  { %1234 = vrot.lane.b32.xlu2 %v1800_v39, %s1876_s18 }
0x1b2e   :  { %v1802_v48 = vpop.eup %1801 }
0x1b2f   :  { %v1215_v40 = vadd.f32 1.0, %v1802_v48 }
0x1b31   :  { %1803 = vrcp.f32 %v1215_v40  ;;  %v1227_v34 = vand.u32 2147483648, %v1215_v40  ;;  %vm1221_vm2 = vweird.f32 %v1215_v40  ;;  %v1225_v57 = vand.u32 2147483647, %v1215_v40 }
0x1b33   :  { %v1228_v61 = vor.u32 1.1754944e-38, %v1227_v34  ;;  %vm1226_vm4 = vcmp.eq.f32.partialorder %v1225_v57, 8.507059e+37 }
0x1b37   :  { %v1804_v32 = vpop.eup %1803 }
0x1b38   :  { %v1217_v9 = vmul.f32 %v1804_v32, %v1215_v40  ;;  %vm1222_vm1 = vweird.f32 %v1804_v32 }
0x1b39   :  { %vm1223_vm3 = vmor %vm1221_vm2, %vm1222_vm1 }
0x1b3a   :  { %v1218_v55 = vsub.f32 1.0, %v1217_v9 }
0x1b3c   :  { %v1219_v33 = vmul.f32 %v1804_v32, %v1218_v55 }
0x1b3e   :  { %v1220_v56 = vadd.f32 %v1804_v32, %v1219_v33 }
0x1b40   :  { %v1224_v60 = vsel %vm1223_vm3, %v1804_v32, %v1220_v56 }
0x1b41   :  { %v1229_v7 = vsel %vm1226_vm4, %v1228_v61, %v1224_v60 }
0x1b42   :  { %v1232_v10 = vmul.f32 %v1229_v7, %v2397_v20 }
0x1b87   :  { %v1235_v5 = vpop.permute.xlu2 %1234 }
0x1b88   :  { %v1237_v8 = vmul.f32 %v1235_v5, %v1229_v7 }
0x1b8a   :  { %1239 = vrot.lane.b32.xlu0 %v1237_v8, %s1877_s5 }
0x1bfc   :  { %v1240_v11 = vpop.permute.xlu0 %1239 }
0x1bfd   :  { %v2439_v13 = vadd.f32 %v1240_v11, %v1232_v10 }
0x1bff   :  { %1805 = vtanh.f32 %v2439_v13 }
0x1c05   :  { %v1806_v14 = vpop.eup %1805 }
0x1c06   :  { %1245 = vrot.lane.b32.xlu1 %v1806_v14, %s1876_s18 }
0x1c78   :  { %v1246_v15 = vpop.permute.xlu1 %1245 }
0x1c79   :  { %v1248_v0 = vmul.f32 %v1246_v15, %v1229_v7 }
0x1c7b   :  { %1250 = vrot.lane.b32.xlu2 %v1248_v0, %s1877_s5 }
0x1cd5   :  { %v1251_v1 = vpop.permute.xlu2 %1250 }
0x1cd6   :  { %1681 = vmatmul.msk.f32.vlgmr.msrb.gmra.mxu2 %vm103_vm5, %v1251_v1  ;;  %1685 = vmatmul.msk.f32.vlgmr.msra.gmra.mxu1 %vm103_vm5, %v1251_v1 }
0x1cd7   :  { %1425 = vmatpush.msra.mxu1 %v2109_v41 }
0x1cd9   :  { %1426 = vmatpush.msra.mxu1 %v2114_v42 }
0x1cdb   :  { %1427 = vmatpush.msra.mxu1 %v2120_v3 }
0x1cdd   :  { %1428 = vmatpush.msra.mxu1 %v2126_v43 }
0x1cdf   :  { %1429 = vmatpush.msra.mxu1 %v2142_v45 }
0x1ce1   :  { %1430 = vmatpush.msra.mxu1 %v2155_v47 }
0x1ce3   :  { %1431 = vmatpush.msra.mxu1 %v2170_v49 }
0x1ce5   :  { %1432 = vmatpush.msra.mxu1 %v2178_v50 }
0x1ce7   :  { %1433 = vmatpush.msra.mxu1 %v2188_v51 }
0x1ce9   :  { %1434 = vmatpush.msra.mxu1 %v2196_v52 }
0x1ceb   :  { %1435 = vmatpush.msra.mxu1 %v2204_v53 }
0x1ced   :  { %1436 = vmatpush.msra.mxu1 %v2212_v54 }
0x1cef   :  { %1437 = vmatpush.msra.mxu1 %v2223_v58 }
0x1cf1   :  { %1438 = vmatpush.msra.mxu1 %v2230_v59 }
0x1cf3   :  { %1439 = vmatpush.msra.mxu1 %v2237_v62 }
0x1cf5   :  { %1440 = vmatpush.msra.mxu1 %v2244_v63 }
0x1d53   :  { %v1305_v22 = vpop.f32.mrf.mxu1 }
0x1d59   :  { %v1271_v17 = vpop.f32.mrf.mxu2 }
0x1d5a   :  { %v1272_v18 = vadd.f32 %v2350_v38, %v1271_v17 }
0x1d5c   :  { %1682 = vst [vmem:[%s2539_s11 + $0x18] sm:$0xff] %v1272_v18  ;;  %v1286_v20 = vmul.f32 %v1285_v6, %v1272_v18 }
0x1d5e   :  { %v1287_v21 = vadd.f32 %v1286_v20, %v1283_v19 }
0x1d60   :  { %1324 = vmatmul.f32.vlgmr.msra.gmra.mxu2 %v1287_v21 }
0x1de3   :  { %v1325_v23 = vpop.f32.mrf.mxu2 }
0x1de4   :  { %v1326_v24 = vadd.f32 %v1325_v23, %v1305_v22  ;;  %v1696_v22 = vld [vmem:[%s2530_s2 + $0x30] sm:$0xff]  ;;  %v1516_v23 = vstv %s1513_s6 }
0x1de6   :  { %v1328_v25 = vadd.f32 %v2286_v12, %v1326_v24 }
0x1de8   :  { %1807 = vtanh.f32 %v1328_v25  ;;  %v1686_v27 = vmul.f32 -1.442695, %v1328_v25  ;;  %v1519_v25 = vstv %s1518_s12 }
0x1dea   :  { %1809 = vpow2.f32 %v1686_v27  ;;  %v1517_v27 = vmul.f32 %v1696_v22, %v1516_v23 }
0x1dee   :  { %v1808_v26 = vpop.eup %1807 }
0x1def   :  { %1351 = vrot.lane.b32.xlu0 %v1808_v26, %s1876_s18 }
0x1df0   :  { %v1810_v28 = vpop.eup %1809 }
0x1df1   :  { %v1332_v29 = vadd.f32 1.0, %v1810_v28 }
0x1df3   :  { %1811 = vrcp.f32 %v1332_v29  ;;  %v1344_v44 = vand.u32 2147483648, %v1332_v29  ;;  %vm1338_vm7 = vweird.f32 %v1332_v29  ;;  %v1342_v37 = vand.u32 2147483647, %v1332_v29 }
0x1df5   :  { %v1345_v46 = vor.u32 1.1754944e-38, %v1344_v44  ;;  %vm1343_vm9 = vcmp.eq.f32.partialorder %v1342_v37, 8.507059e+37 }
0x1df9   :  { %v1812_v31 = vpop.eup %1811 }
0x1dfa   :  { %v1334_v35 = vmul.f32 %v1812_v31, %v1332_v29  ;;  %vm1339_vm6 = vweird.f32 %v1812_v31 }
0x1dfb   :  { %vm1340_vm8 = vmor %vm1338_vm7, %vm1339_vm6 }
0x1dfc   :  { %v1335_v4 = vsub.f32 1.0, %v1334_v35 }
0x1dfe   :  { %v1336_v30 = vmul.f32 %v1812_v31, %v1335_v4 }
0x1e00   :  { %v1337_v36 = vadd.f32 %v1812_v31, %v1336_v30 }
0x1e02   :  { %v1341_v39 = vsel %vm1340_vm8, %v1812_v31, %v1337_v36 }
0x1e03   :  { %v1346_v40 = vsel %vm1343_vm9, %v1345_v46, %v1341_v39 }
0x1e04   :  { %v1349_v9 = vmul.f32 %v1346_v40, %v2439_v13 }
0x1e61   :  { %v1352_v48 = vpop.permute.xlu0 %1351 }
0x1e62   :  { %v1354_v32 = vmul.f32 %v1352_v48, %v1346_v40 }
0x1e64   :  { %1356 = vrot.lane.b32.xlu1 %v1354_v32, %s1877_s5 }
0x1ed6   :  { %v1357_v55 = vpop.permute.xlu1 %1356 }
0x1ed7   :  { %v2473_v33 = vadd.f32 %v1357_v55, %v1349_v9 }
0x1ed9   :  { %1813 = vtanh.f32 %v2473_v33 }
0x1edf   :  { %v1814_v56 = vpop.eup %1813 }
0x1ee0   :  { %1362 = vrot.lane.b32.xlu2 %v1814_v56, %s1876_s18 }
0x1f3a   :  { %v1363_v34 = vpop.permute.xlu2 %1362 }
0x1f3b   :  { %v1365_v57 = vmul.f32 %v1363_v34, %v1346_v40 }
0x1f3d   :  { %1367 = vrot.lane.b32.xlu0 %v1365_v57, %s1877_s5 }
0x1faf   :  { %v1368_v60 = vpop.permute.xlu0 %1367 }
0x1fb0   :  { %1687 = vmatmul.msk.f32.vlgmr.msrb.gmra.mxu1 %vm103_vm5, %v1368_v60  ;;  %1691 = vmatmul.msk.f32.vlgmr.msrb.gmra.mxu0 %vm103_vm5, %v1368_v60 }
0x1fb1   :  { %1542 = vmatpush.msrb.mxu0 %v2109_v41  ;;  %v1690_v41 = vld [vmem:[%s2530_s2 + $0x28] sm:$0xff] }
0x1fb3   :  { %1543 = vmatpush.msrb.mxu0 %v2114_v42  ;;  %v1399_v42 = vstv %s1396_s27 }
0x1fb5   :  { %1544 = vmatpush.msrb.mxu0 %v2120_v3 }
0x1fb7   :  { %1545 = vmatpush.msrb.mxu0 %v2126_v43  ;;  %v1402_v43 = vstv %s1401_s10 }
0x1fb9   :  { %1546 = vmatpush.msrb.mxu0 %v2142_v45 }
0x1fbb   :  { %1547 = vmatpush.msrb.mxu0 %v2155_v47  ;;  %v1400_v47 = vmul.f32 %v1690_v41, %v1399_v42 }
0x1fbd   :  { %1548 = vmatpush.msrb.mxu0 %v2170_v49 }
0x1fbf   :  { %1549 = vmatpush.msrb.mxu0 %v2178_v50 }
0x1fc1   :  { %1550 = vmatpush.msrb.mxu0 %v2188_v51 }
0x1fc3   :  { %1551 = vmatpush.msrb.mxu0 %v2196_v52 }
0x1fc5   :  { %1552 = vmatpush.msrb.mxu0 %v2204_v53 }
0x1fc7   :  { %1553 = vmatpush.msrb.mxu0 %v2212_v54 }
0x1fc9   :  { %1554 = vmatpush.msrb.mxu0 %v2223_v58 }
0x1fcb   :  { %1555 = vmatpush.msrb.mxu0 %v2230_v59 }
0x1fcd   :  { %1556 = vmatpush.msrb.mxu0 %v2237_v62 }
0x1fcf   :  { %1557 = vmatpush.msrb.mxu0 %v2244_v63 }
0x202d   :  { %v1388_v3 = vpop.f32.mrf.mxu1  ;;  %v1422_v51 = vpop.f32.mrf.mxu0 }
0x202e   :  { %v1389_v45 = vadd.f32 %v2350_v38, %v1388_v3 }
0x2030   :  { %1688 = vst [vmem:[%s2539_s11 + $0x20] sm:$0xff] %v1389_v45  ;;  %v1403_v49 = vmul.f32 %v1402_v43, %v1389_v45 }
0x2032   :  { %v1404_v50 = vadd.f32 %v1403_v49, %v1400_v47 }
0x2034   :  { %1441 = vmatmul.f32.vlgmr.msra.gmra.mxu1 %v1404_v50 }
0x20b1   :  { %v1442_v52 = vpop.f32.mrf.mxu1 }
0x20b2   :  { %v1443_v53 = vadd.f32 %v1442_v52, %v1422_v51 }
0x20b4   :  { %v1445_v54 = vadd.f32 %v2286_v12, %v1443_v53 }
0x20b6   :  { %1815 = vtanh.f32 %v1445_v54  ;;  %v1692_v59 = vmul.f32 -1.442695, %v1445_v54 }
0x20b8   :  { %1817 = vpow2.f32 %v1692_v59 }
0x20bc   :  { %v1816_v58 = vpop.eup %1815 }
0x20bd   :  { %1468 = vrot.lane.b32.xlu1 %v1816_v58, %s1876_s18 }
0x20be   :  { %v1818_v62 = vpop.eup %1817 }
0x20bf   :  { %v1449_v63 = vadd.f32 1.0, %v1818_v62 }
0x20c1   :  { %1819 = vrcp.f32 %v1449_v63  ;;  %v1461_v11 = vand.u32 2147483648, %v1449_v63  ;;  %vm1455_vm11 = vweird.f32 %v1449_v63  ;;  %v1459_v13 = vand.u32 2147483647, %v1449_v63 }
0x20c3   :  { %v1462_v15 = vor.u32 1.1754944e-38, %v1461_v11  ;;  %vm1460_vm13 = vcmp.eq.f32.partialorder %v1459_v13, 8.507059e+37 }
0x20c7   :  { %v1820_v61 = vpop.eup %1819 }
0x20c8   :  { %v1451_v5 = vmul.f32 %v1820_v61, %v1449_v63  ;;  %vm1456_vm10 = vweird.f32 %v1820_v61 }
0x20c9   :  { %vm1457_vm12 = vmor %vm1455_vm11, %vm1456_vm10 }
0x20ca   :  { %v1452_v7 = vsub.f32 1.0, %v1451_v5 }
0x20cc   :  { %v1453_v8 = vmul.f32 %v1820_v61, %v1452_v7 }
0x20ce   :  { %v1454_v10 = vadd.f32 %v1820_v61, %v1453_v8 }
0x20d0   :  { %v1458_v14 = vsel %vm1457_vm12, %v1820_v61, %v1454_v10 }
0x20d1   :  { %v1463_v1 = vsel %vm1460_vm13, %v1462_v15, %v1458_v14 }
0x20d2   :  { %v1466_v2 = vmul.f32 %v1463_v1, %v2473_v33 }
0x212f   :  { %v1469_v0 = vpop.permute.xlu1 %1468 }
0x2130   :  { %v1471_v16 = vmul.f32 %v1469_v0, %v1463_v1 }
0x2132   :  { %1473 = vrot.lane.b32.xlu2 %v1471_v16, %s1877_s5 }
0x218c   :  { %v1474_v17 = vpop.permute.xlu2 %1473 }
0x218d   :  { %v1476_v6 = vadd.f32 %v1474_v17, %v1466_v2 }
0x218f   :  { %1821 = vtanh.f32 %v1476_v6 }
0x2195   :  { %v1822_v18 = vpop.eup %1821 }
0x2196   :  { %1479 = vrot.lane.b32.xlu0 %v1822_v18, %s1876_s18 }
0x2208   :  { %v1480_v19 = vpop.permute.xlu0 %1479 }
0x2209   :  { %v1482_v20 = vmul.f32 %v1480_v19, %v1463_v1 }
0x220b   :  { %1484 = vrot.lane.b32.xlu1 %v1482_v20, %s1877_s5 }
0x227d   :  { %v1485_v21 = vpop.permute.xlu1 %1484 }
0x227e   :  { %1693 = vmatmul.msk.f32.vlgmr.msra.gmra.mxu0 %vm103_vm5, %v1485_v21  ;;  %1697 = vmatmul.msk.f32.vlgmr.msrb.gmra.mxu3 %vm103_vm5, %v1485_v21 }
0x22fb   :  { %v1505_v24 = vpop.f32.mrf.mxu0 }
0x22fc   :  { %v1506_v26 = vadd.f32 %v2350_v38, %v1505_v24 }
0x22fe   :  { %1694 = vst [vmem:[%s2539_s11 + $0x28] sm:$0xff] %v1506_v26  ;;  %v1520_v28 = vmul.f32 %v1519_v25, %v1506_v26 }
0x2300   :  { %v1521_v29 = vadd.f32 %v1520_v28, %v1517_v27 }
0x2301   :  { %v1539_v31 = vpop.f32.mrf.mxu3 }
0x2302   :  { %1558 = vmatmul.f32.vlgmr.msrb.gmra.mxu0 %v1521_v29 }
0x237f   :  { %v1559_v35 = vpop.f32.mrf.mxu0 }
0x2380   :  { %v1560_v4 = vadd.f32 %v1559_v35, %v1539_v31 }
0x2382   :  { %v1562_v30 = vadd.f32 %v2286_v12, %v1560_v4 }
0x2384   :  { %1823 = vtanh.f32 %v1562_v30  ;;  %v1698_v44 = vmul.f32 -1.442695, %v1562_v30 }
0x2386   :  { %1825 = vpow2.f32 %v1698_v44 }
0x238a   :  { %v1824_v36 = vpop.eup %1823 }
0x238b   :  { %1585 = vrot.lane.b32.xlu2 %v1824_v36, %s1876_s18 }
0x238c   :  { %v1826_v37 = vpop.eup %1825 }
0x238d   :  { %v1566_v39 = vadd.f32 1.0, %v1826_v37 }
0x238f   :  { %1827 = vrcp.f32 %v1566_v39  ;;  %v1578_v55 = vand.u32 2147483648, %v1566_v39  ;;  %vm1572_vm15 = vweird.f32 %v1566_v39  ;;  %v1576_v33 = vand.u32 2147483647, %v1566_v39 }
0x2391   :  { %v1579_v56 = vor.u32 1.1754944e-38, %v1578_v55  ;;  %vm1577_vm1 = vcmp.eq.f32.partialorder %v1576_v33, 8.507059e+37 }
0x2395   :  { %v1828_v46 = vpop.eup %1827 }
0x2396   :  { %v1568_v48 = vmul.f32 %v1828_v46, %v1566_v39  ;;  %vm1573_vm14 = vweird.f32 %v1828_v46 }
0x2397   :  { %vm1574_vm0 = vmor %vm1572_vm15, %vm1573_vm14 }
0x2398   :  { %v1569_v40 = vsub.f32 1.0, %v1568_v48 }
0x239a   :  { %v1570_v32 = vmul.f32 %v1828_v46, %v1569_v40 }
0x239c   :  { %v1571_v9 = vadd.f32 %v1828_v46, %v1570_v32 }
0x239e   :  { %v1575_v12 = vsel %vm1574_vm0, %v1828_v46, %v1571_v9 }
0x239f   :  { %v1580_v57 = vsel %vm1577_vm1, %v1579_v56, %v1575_v12 }
0x23a0   :  { %v1583_v41 = vmul.f32 %v1580_v57, %v1476_v6 }
0x23e5   :  { %v1586_v34 = vpop.permute.xlu2 %1585 }
0x23e6   :  { %v1588_v60 = vmul.f32 %v1586_v34, %v1580_v57 }
0x23e8   :  { %1590 = vrot.lane.b32.xlu0 %v1588_v60, %s1877_s5 }
0x245a   :  { %v1591_v42 = vpop.permute.xlu0 %1590 }
0x245b   :  { %v1593_v3 = vadd.f32 %v1591_v42, %v1583_v41 }
0x245d   :  { %1829 = vtanh.f32 %v1593_v3 }
0x2463   :  { %v1830_v43 = vpop.eup %1829 }
0x2464   :  { %1596 = vrot.lane.b32.xlu1 %v1830_v43, %s1876_s18 }
0x24d6   :  { %v1597_v45 = vpop.permute.xlu1 %1596 }
0x24d7   :  { %v1599_v47 = vmul.f32 %v1597_v45, %v1580_v57 }
0x24d9   :  { %1601 = vrot.lane.b32.xlu2 %v1599_v47, %s1877_s5 }
0x2533   :  { %v1602_v49 = vpop.permute.xlu2 %1601 }
0x2534   :  { %1699 = vmatmul.msk.f32.vlgmr.msra.gmra.mxu3 %vm103_vm5, %v1602_v49 }
0x25b7   :  { %v1622_v50 = vpop.f32.mrf.mxu3 }
0x25b8   :  { %v1623_v51 = vadd.f32 %v2350_v38, %v1622_v50 }
0x25ba   :  { %1700 = vst [vmem:[%s2539_s11 + $0x30] sm:$0xff] %v1623_v51 }
0x25bb   :  { %1631 = vsyncpa [#allocation5], 1 }

</bundles_post_ra>
